<compile_context>
chip_gen: v7x
topology: tpu7x:2x2x1
jax: 0.10.0
libtpu: 0.0.40
codegen_flags: <defaults>
</compile_context>

<pallas_src>
import functools

import jax
import jax.numpy as jnp
from jax.experimental import pallas as pl
from jax.experimental.pallas import tpu as pltpu


# ---------------------------------------------------------------------------
# Pallas kernel: blocked LSTM recurrence (T_BLK timesteps per grid iteration)
# ---------------------------------------------------------------------------
def lstm_block_kernel(gx_ref, whh_ref, out_ref, h_sc, c_sc, *, t_blk, hp):
    """gx_ref:  [T_BLK, Bb, 4*Hp] bf16  precomputed x-projection + bias
       whh_ref: [Hp, 4*Hp]        bf16  W_hh^T (constant index_map, single-buffered)
       out_ref: [T_BLK, Bb, Hp]   bf16  hidden states for this time block
       h_sc/c_sc: [Bb, Hp] f32 VMEM scratch carrying state across TIME grid steps only."""
    # New batch block -> reset the recurrent state (time axis is grid axis 1).
    @pl.when(pl.program_id(1) == 0)
    def _():
        h_sc[...] = jnp.zeros(h_sc.shape, h_sc.dtype)
        c_sc[...] = jnp.zeros(c_sc.shape, c_sc.dtype)

    w_hh = whh_ref[...]                                    # [Hp, 4Hp] bf16, reused every step

    # Carry h/c as register values across the unrolled steps; touch scratch only at the
    # block boundary (avoids 2 vld + 2 vst of a [Bb,Hp] f32 tile on every timestep).
    h = h_sc[...]                                          # [Bb, Hp] f32
    c = c_sc[...]                                          # [Bb, Hp] f32

    for tt in range(t_blk):                                # static unroll (t_blk is Python int)
        # Only the recurrent matmul sits on the serial path; bf16 in, f32 accumulate.
        gates = jnp.dot(h.astype(jnp.bfloat16), w_hh,
                        preferred_element_type=jnp.float32)        # [Bb, 4Hp] f32
        gates = gates + gx_ref[tt].astype(jnp.float32)             # add bf16 x-projection in f32

        # PyTorch gate order (i, f, g, o); slices are 128-lane aligned since Hp % 128 == 0.
        i_g = jax.nn.sigmoid(gates[:, 0 * hp:1 * hp])
        f_g = jax.nn.sigmoid(gates[:, 1 * hp:2 * hp])
        g_g = jnp.tanh(gates[:, 2 * hp:3 * hp])
        o_g = jax.nn.sigmoid(gates[:, 3 * hp:4 * hp])

        c = f_g * c + i_g * g_g
        h = o_g * jnp.tanh(c)
        out_ref[tt] = h.astype(out_ref.dtype)              # full [Bb, Hp] lane-dense store

    # Write the carry once per block (only needed across grid steps).
    h_sc[...] = h
    c_sc[...] = c


def lstm_recurrence(gates_x, w_hh_t, *, t_blk, b_blk):
    """gates_x: [Lp, Bp, 4*Hp] bf16 (time-major, bias already folded in)
       w_hh_t:  [Hp, 4*Hp] bf16
       returns: [Lp, Bp, Hp] bf16."""
    Lp, Bp, G = gates_x.shape
    Hp = G // 4
    n_tblk = Lp // t_blk
    n_bblk = Bp // b_blk

    kernel = functools.partial(lstm_block_kernel, t_blk=t_blk, hp=Hp)
    return pl.pallas_call(
        kernel,
        out_shape=jax.ShapeDtypeStruct((Lp, Bp, Hp), jnp.bfloat16),
        grid_spec=pltpu.PrefetchScalarGridSpec(
            num_scalar_prefetch=0,
            grid=(n_bblk, n_tblk),                         # batch blocks outer, time inner
            in_specs=[
                # x-projection for this (batch block, time block); double-buffered by default.
                pl.BlockSpec((t_blk, b_blk, G), lambda b, t: (t, b, 0)),
                # W_hh^T: constant block index -> fetched once; single-buffered to halve its
                # VMEM footprint (matters for v7x's 64 MiB VMEM).
                pl.BlockSpec((Hp, G), lambda b, t: (0, 0), pipeline_mode=pl.Buffered(1)),
            ],
            out_specs=pl.BlockSpec((t_blk, b_blk, Hp), lambda b, t: (t, b, 0)),
            scratch_shapes=[
                pltpu.VMEM((b_blk, Hp), jnp.float32),      # h carry (per batch block)
                pltpu.VMEM((b_blk, Hp), jnp.float32),      # c carry (per batch block)
            ],
        ),
        compiler_params=pltpu.CompilerParams(
            # batch blocks are independent (v7x: shard across the 2 TensorCores);
            # the time recurrence is strictly sequential.
            dimension_semantics=("parallel", "arbitrary"),
            # raise above the scoped default (16 MiB v5e / 32 MiB v6e+) but stay well
            # inside v7x's 64 MiB physical VMEM.
            vmem_limit_bytes=48 * 1024 * 1024,
        ),
    )(gates_x, w_hh_t)


# ---------------------------------------------------------------------------
# Wrapper: embedding gather + hoisted x-projection GEMM (plain XLA glue)
# ---------------------------------------------------------------------------
def _round_up(x, m):
    return ((x + m - 1) // m) * m


def _pad_gate_dim(w, h, hp):
    """Pad the trailing 4H dim to 4Hp, zero-padding each (i,f,g,o) chunk separately."""
    lead = w.shape[:-1]
    w4 = w.reshape(lead + (4, h))
    w4 = jnp.pad(w4, [(0, 0)] * len(lead) + [(0, 0), (0, hp - h)])
    return w4.reshape(lead + (4 * hp,))


def _choose_b_blk(bp):
    # Split the batch into two blocks (-> two TensorCores on v7x) only when each block
    # still fills the MXU well; otherwise keep one block (no extra grid overhead).
    if bp >= 256 and bp % 16 == 0:
        return bp // 2
    return bp


def lstm_encoder_forward(tokens, params, *, t_blk=16):
    """tokens: int32 [B, L] -> features float32 [B, L, H] (batch_first, like PyTorch)."""
    emb_table = params["embedding"]          # [V, E]
    w_ih = params["w_ih"]                    # [E, 4H]  (transposed PyTorch weight_ih_l0)
    w_hh = params["w_hh"]                    # [H, 4H]  (transposed PyTorch weight_hh_l0)
    bias = params["bias"]                    # [4H]     (b_ih + b_hh)

    B, L = tokens.shape
    H = w_hh.shape[0]

    Hp = _round_up(H, 128)                   # lane-aligned hidden dim
    Bp = _round_up(B, 8)                     # sublane-aligned batch
    t_blk = max(1, min(t_blk, _round_up(L, 8)))   # don't over-pad short sequences
    Lp = _round_up(L, t_blk)                 # whole number of time blocks
    b_blk = _choose_b_blk(Bp)

    # Zero padding keeps padded hidden units identically zero through the recurrence
    # (their gates see zero weights/bias: c = 0.5*0 + 0.5*tanh(0) = 0, h = 0.5*tanh(0) = 0),
    # and padded batch rows / trailing timesteps are independent of the real ones.
    w_ih_p = _pad_gate_dim(w_ih, H, Hp)                                   # [E, 4Hp]
    w_hh_p = jnp.pad(_pad_gate_dim(w_hh, H, Hp), ((0, Hp - H), (0, 0)))   # [Hp, 4Hp]
    bias_p = _pad_gate_dim(bias, H, Hp)                                   # [4Hp]

    # Time-major embedding gather (transpose the cheap int32 tokens, not the activations).
    tok_p = jnp.pad(tokens, ((0, Bp - B), (0, Lp - L)))                   # [Bp, Lp]
    emb = jnp.take(emb_table, tok_p.T, axis=0)                            # [Lp, Bp, E]

    # Hoisted input projection: one large GEMM over all timesteps (bf16 in / f32 acc),
    # bias folded in; streamed into the kernel as bf16 to halve DMA + VMEM.
    gates_x = (
        jnp.einsum(
            "lbe,eg->lbg",
            emb.astype(jnp.bfloat16), w_ih_p.astype(jnp.bfloat16),
            preferred_element_type=jnp.float32,
        )
        + bias_p[None, None, :]
    ).astype(jnp.bfloat16)                                                # [Lp, Bp, 4Hp] bf16

    feats_tbh = lstm_recurrence(gates_x, w_hh_p.astype(jnp.bfloat16),
                                t_blk=t_blk, b_blk=b_blk)                 # [Lp, Bp, Hp] bf16

    # Slice padding off BEFORE the transpose and transpose in bf16 (smaller HBM round trip),
    # then cast back to f32 to match the PyTorch module's output dtype.
    feats = jnp.transpose(feats_tbh[:L, :B, :H], (1, 0, 2))               # [B, L, H] bf16
    return feats.astype(jnp.float32)


# ---------------------------------------------------------------------------
# Pure-JAX f32 reference (for correctness check only)
# ---------------------------------------------------------------------------
def lstm_encoder_reference(tokens, params):
    emb = jnp.take(params["embedding"], tokens, axis=0)          # [B, L, E]
    w_ih, w_hh, bias = params["w_ih"], params["w_hh"], params["bias"]
    H = w_hh.shape[0]
    B = tokens.shape[0]

    def step(carry, x_t):
        h, c = carry
        gates = x_t @ w_ih + h @ w_hh + bias
        i_g = jax.nn.sigmoid(gates[:, 0 * H:1 * H])
        f_g = jax.nn.sigmoid(gates[:, 1 * H:2 * H])
        g_g = jnp.tanh(gates[:, 2 * H:3 * H])
        o_g = jax.nn.sigmoid(gates[:, 3 * H:4 * H])
        c = f_g * c + i_g * g_g
        h = o_g * jnp.tanh(c)
        return (h, c), h

    init = (jnp.zeros((B, H), jnp.float32), jnp.zeros((B, H), jnp.float32))
    _, hs = jax.lax.scan(step, init, jnp.transpose(emb, (1, 0, 2)))
    return jnp.transpose(hs, (1, 0, 2))                          # [B, L, H]


def init_params(key, vocab_size, embed_dim, hidden_dim):
    k1, k2, k3, k4, k5 = jax.random.split(key, 5)
    scale = 1.0 / jnp.sqrt(hidden_dim)
    return {
        "embedding": jax.random.normal(k1, (vocab_size, embed_dim), jnp.float32),
        # stored pre-transposed relative to PyTorch ([4H,E] -> [E,4H], [4H,H] -> [H,4H])
        "w_ih": jax.random.uniform(k2, (embed_dim, 4 * hidden_dim), jnp.float32, -scale, scale),
        "w_hh": jax.random.uniform(k3, (hidden_dim, 4 * hidden_dim), jnp.float32, -scale, scale),
        "bias": (
            jax.random.uniform(k4, (4 * hidden_dim,), jnp.float32, -scale, scale)
            + jax.random.uniform(k5, (4 * hidden_dim,), jnp.float32, -scale, scale)
        ),
    }


if __name__ == "__main__":
    VOCAB, EMBED, HIDDEN = 64, 32, 32
    B, L = 2, 8

    key = jax.random.PRNGKey(0)
    kp, kt = jax.random.split(key)
    params = init_params(kp, VOCAB, EMBED, HIDDEN)
    tokens = jax.random.randint(kt, (B, L), 0, VOCAB, dtype=jnp.int32)

    feats = jax.jit(lstm_encoder_forward)(tokens, params)
    feats = jax.block_until_ready(feats)
    assert feats.shape == (B, L, HIDDEN), feats.shape

    ref = lstm_encoder_reference(tokens, params)
    max_err = float(jnp.max(jnp.abs(feats - ref)))
    assert max_err < 5e-2, f"max abs error vs f32 reference: {max_err}"

    print("KERNEL_OK")
</pallas_src>

<mosaic_0001>
module attributes {stable_mosaic.version = 11 : i64} {
  func.func @lstm_block_kernel(%arg0: i32, %arg1: i32, %arg2: memref<8x8x512xbf16, #tpu.memory_space<vmem>>, %arg3: memref<128x512xbf16, #tpu.memory_space<vmem>>, %arg4: memref<8x8x128xbf16, #tpu.memory_space<vmem>>, %arg5: memref<8x128xf32, #tpu.memory_space<vmem>>, %arg6: memref<8x128xf32, #tpu.memory_space<vmem>>) attributes {dimension_semantics = [#tpu.dimension_semantics<parallel>, #tpu.dimension_semantics<arbitrary>], iteration_bounds = array<i64: 1, 1>, scalar_prefetch = 0 : i64, scratch_operands = 2 : i64, tpu.core_type = #tpu.core_type<tc>, window_params = [{transform_indices = @transform_0, window_bounds = array<i64: 8, 8, 512>}, {pipeline_mode = #tpu.pipeline_mode<synchronous>, transform_indices = @transform_1, window_bounds = array<i64: 128, 512>}, {transform_indices = @transform_2, window_bounds = array<i64: 8, 8, 128>}]} {
    %c0_i32 = arith.constant 0 : i32
    %0 = arith.cmpi eq, %arg1, %c0_i32 : i32
    %1 = arith.extui %0 : i1 to i32
    %c0_i32_0 = arith.constant 0 : i32
    %2 = arith.cmpi ne, %1, %c0_i32_0 : i32
    scf.if %2 {
      %cst_82 = arith.constant 0.000000e+00 : f32
      %288 = vector.broadcast %cst_82 : f32 to vector<8x128xf32>
      %c0_83 = arith.constant 0 : index
      %c0_84 = arith.constant 0 : index
      %289 = vector.load %arg5[%c0_83, %c0_84] : memref<8x128xf32, #tpu.memory_space<vmem>>, vector<8x128xf32>
      tpu.vector_store %arg5[%c0_83, %c0_84], %288 {strides = array<i32>} : memref<8x128xf32, #tpu.memory_space<vmem>>, vector<8x128xf32>,
      %cst_85 = arith.constant 0.000000e+00 : f32
      %290 = vector.broadcast %cst_85 : f32 to vector<8x128xf32>
      %c0_86 = arith.constant 0 : index
      %c0_87 = arith.constant 0 : index
      %291 = vector.load %arg6[%c0_86, %c0_87] : memref<8x128xf32, #tpu.memory_space<vmem>>, vector<8x128xf32>
      tpu.vector_store %arg6[%c0_86, %c0_87], %290 {strides = array<i32>} : memref<8x128xf32, #tpu.memory_space<vmem>>, vector<8x128xf32>,
    } else {
    }
    %c0 = arith.constant 0 : index
    %c0_1 = arith.constant 0 : index
    %3 = vector.load %arg3[%c0, %c0_1] : memref<128x512xbf16, #tpu.memory_space<vmem>>, vector<128x512xbf16>
    %c0_2 = arith.constant 0 : index
    %c0_3 = arith.constant 0 : index
    %4 = vector.load %arg5[%c0_2, %c0_3] : memref<8x128xf32, #tpu.memory_space<vmem>>, vector<8x128xf32>
    %c0_4 = arith.constant 0 : index
    %c0_5 = arith.constant 0 : index
    %5 = vector.load %arg6[%c0_4, %c0_5] : memref<8x128xf32, #tpu.memory_space<vmem>>, vector<8x128xf32>
    %6 = arith.truncf %4 : vector<8x128xf32> to vector<8x128xbf16>
    %cst = arith.constant dense<0.000000e+00> : vector<8x512xf32>
    %7 = tpu.matmul %6, %3, %cst {dimension_numbers = #tpu.dot_dimension_numbers<[1], [0], [0], [1], [0, 0, 1, 1], [], []>} : vector<8x128xbf16>, vector<128x512xbf16>, vector<8x512xf32> -> vector<8x512xf32>
    %c0_6 = arith.constant 0 : index
    %c0_7 = arith.constant 0 : index
    %c0_8 = arith.constant 0 : index
    %8 = vector.load %arg2[%c0_6, %c0_7, %c0_8] : memref<8x8x512xbf16, #tpu.memory_space<vmem>>, vector<1x8x512xbf16>
    %9 = vector.shape_cast %8 : vector<1x8x512xbf16> to vector<8x512xbf16>
    %10 = arith.extf %9 : vector<8x512xbf16> to vector<8x512xf32>
    %11 = arith.addf %7, %10 : vector<8x512xf32>
    %12 = vector.extract_strided_slice %11 {offsets = [0, 0], sizes = [8, 128], strides = [1, 1]} : vector<8x512xf32> to vector<8x128xf32>
    %13 = arith.negf %12 : vector<8x128xf32>
    %14 = math.exp %13 : vector<8x128xf32>
    %cst_9 = arith.constant 1.000000e+00 : f32
    %15 = vector.broadcast %cst_9 : f32 to vector<8x128xf32>
    %16 = arith.addf %15, %14 : vector<8x128xf32>
    %17 = arith.divf %15, %16 : vector<8x128xf32>
    %18 = vector.extract_strided_slice %11 {offsets = [0, 128], sizes = [8, 128], strides = [1, 1]} : vector<8x512xf32> to vector<8x128xf32>
    %19 = arith.negf %18 : vector<8x128xf32>
    %20 = math.exp %19 : vector<8x128xf32>
    %cst_10 = arith.constant 1.000000e+00 : f32
    %21 = vector.broadcast %cst_10 : f32 to vector<8x128xf32>
    %22 = arith.addf %21, %20 : vector<8x128xf32>
    %23 = arith.divf %21, %22 : vector<8x128xf32>
    %24 = vector.extract_strided_slice %11 {offsets = [0, 256], sizes = [8, 128], strides = [1, 1]} : vector<8x512xf32> to vector<8x128xf32>
    %25 = math.tanh %24 : vector<8x128xf32>
    %26 = vector.extract_strided_slice %11 {offsets = [0, 384], sizes = [8, 128], strides = [1, 1]} : vector<8x512xf32> to vector<8x128xf32>
    %27 = arith.negf %26 : vector<8x128xf32>
    %28 = math.exp %27 : vector<8x128xf32>
    %cst_11 = arith.constant 1.000000e+00 : f32
    %29 = vector.broadcast %cst_11 : f32 to vector<8x128xf32>
    %30 = arith.addf %29, %28 : vector<8x128xf32>
    %31 = arith.divf %29, %30 : vector<8x128xf32>
    %32 = arith.mulf %23, %5 : vector<8x128xf32>
    %33 = arith.mulf %17, %25 : vector<8x128xf32>
    %34 = arith.addf %32, %33 : vector<8x128xf32>
    %35 = math.tanh %34 : vector<8x128xf32>
    %36 = arith.mulf %31, %35 : vector<8x128xf32>
    %37 = arith.truncf %36 : vector<8x128xf32> to vector<8x128xbf16>
    %c0_12 = arith.constant 0 : index
    %c0_13 = arith.constant 0 : index
    %c0_14 = arith.constant 0 : index
    %38 = vector.load %arg4[%c0_12, %c0_13, %c0_14] : memref<8x8x128xbf16, #tpu.memory_space<vmem>>, vector<1x8x128xbf16>
    %39 = vector.shape_cast %38 : vector<1x8x128xbf16> to vector<8x128xbf16>
    %40 = vector.shape_cast %37 : vector<8x128xbf16> to vector<1x8x128xbf16>
    tpu.vector_store %arg4[%c0_12, %c0_13, %c0_14], %40 {strides = array<i32>} : memref<8x8x128xbf16, #tpu.memory_space<vmem>>, vector<1x8x128xbf16>,
    %41 = arith.truncf %36 : vector<8x128xf32> to vector<8x128xbf16>
    %cst_15 = arith.constant dense<0.000000e+00> : vector<8x512xf32>
    %42 = tpu.matmul %41, %3, %cst_15 {dimension_numbers = #tpu.dot_dimension_numbers<[1], [0], [0], [1], [0, 0, 1, 1], [], []>} : vector<8x128xbf16>, vector<128x512xbf16>, vector<8x512xf32> -> vector<8x512xf32>
    %c1 = arith.constant 1 : index
    %c0_16 = arith.constant 0 : index
    %c0_17 = arith.constant 0 : index
    %43 = vector.load %arg2[%c1, %c0_16, %c0_17] : memref<8x8x512xbf16, #tpu.memory_space<vmem>>, vector<1x8x512xbf16>
    %44 = vector.shape_cast %43 : vector<1x8x512xbf16> to vector<8x512xbf16>
    %45 = arith.extf %44 : vector<8x512xbf16> to vector<8x512xf32>
    %46 = arith.addf %42, %45 : vector<8x512xf32>
    %47 = vector.extract_strided_slice %46 {offsets = [0, 0], sizes = [8, 128], strides = [1, 1]} : vector<8x512xf32> to vector<8x128xf32>
    %48 = arith.negf %47 : vector<8x128xf32>
    %49 = math.exp %48 : vector<8x128xf32>
    %cst_18 = arith.constant 1.000000e+00 : f32
    %50 = vector.broadcast %cst_18 : f32 to vector<8x128xf32>
    %51 = arith.addf %50, %49 : vector<8x128xf32>
    %52 = arith.divf %50, %51 : vector<8x128xf32>
    %53 = vector.extract_strided_slice %46 {offsets = [0, 128], sizes = [8, 128], strides = [1, 1]} : vector<8x512xf32> to vector<8x128xf32>
    %54 = arith.negf %53 : vector<8x128xf32>
    %55 = math.exp %54 : vector<8x128xf32>
    %cst_19 = arith.constant 1.000000e+00 : f32
    %56 = vector.broadcast %cst_19 : f32 to vector<8x128xf32>
    %57 = arith.addf %56, %55 : vector<8x128xf32>
    %58 = arith.divf %56, %57 : vector<8x128xf32>
    %59 = vector.extract_strided_slice %46 {offsets = [0, 256], sizes = [8, 128], strides = [1, 1]} : vector<8x512xf32> to vector<8x128xf32>
    %60 = math.tanh %59 : vector<8x128xf32>
    %61 = vector.extract_strided_slice %46 {offsets = [0, 384], sizes = [8, 128], strides = [1, 1]} : vector<8x512xf32> to vector<8x128xf32>
    %62 = arith.negf %61 : vector<8x128xf32>
    %63 = math.exp %62 : vector<8x128xf32>
    %cst_20 = arith.constant 1.000000e+00 : f32
    %64 = vector.broadcast %cst_20 : f32 to vector<8x128xf32>
    %65 = arith.addf %64, %63 : vector<8x128xf32>
    %66 = arith.divf %64, %65 : vector<8x128xf32>
    %67 = arith.mulf %58, %34 : vector<8x128xf32>
    %68 = arith.mulf %52, %60 : vector<8x128xf32>
    %69 = arith.addf %67, %68 : vector<8x128xf32>
    %70 = math.tanh %69 : vector<8x128xf32>
    %71 = arith.mulf %66, %70 : vector<8x128xf32>
    %72 = arith.truncf %71 : vector<8x128xf32> to vector<8x128xbf16>
    %c1_21 = arith.constant 1 : index
    %c0_22 = arith.constant 0 : index
    %c0_23 = arith.constant 0 : index
    %73 = vector.load %arg4[%c1_21, %c0_22, %c0_23] : memref<8x8x128xbf16, #tpu.memory_space<vmem>>, vector<1x8x128xbf16>
    %74 = vector.shape_cast %73 : vector<1x8x128xbf16> to vector<8x128xbf16>
    %75 = vector.shape_cast %72 : vector<8x128xbf16> to vector<1x8x128xbf16>
    tpu.vector_store %arg4[%c1_21, %c0_22, %c0_23], %75 {strides = array<i32>} : memref<8x8x128xbf16, #tpu.memory_space<vmem>>, vector<1x8x128xbf16>,
    %76 = arith.truncf %71 : vector<8x128xf32> to vector<8x128xbf16>
    %cst_24 = arith.constant dense<0.000000e+00> : vector<8x512xf32>
    %77 = tpu.matmul %76, %3, %cst_24 {dimension_numbers = #tpu.dot_dimension_numbers<[1], [0], [0], [1], [0, 0, 1, 1], [], []>} : vector<8x128xbf16>, vector<128x512xbf16>, vector<8x512xf32> -> vector<8x512xf32>
    %c2 = arith.constant 2 : index
    %c0_25 = arith.constant 0 : index
    %c0_26 = arith.constant 0 : index
    %78 = vector.load %arg2[%c2, %c0_25, %c0_26] : memref<8x8x512xbf16, #tpu.memory_space<vmem>>, vector<1x8x512xbf16>
    %79 = vector.shape_cast %78 : vector<1x8x512xbf16> to vector<8x512xbf16>
    %80 = arith.extf %79 : vector<8x512xbf16> to vector<8x512xf32>
    %81 = arith.addf %77, %80 : vector<8x512xf32>
    %82 = vector.extract_strided_slice %81 {offsets = [0, 0], sizes = [8, 128], strides = [1, 1]} : vector<8x512xf32> to vector<8x128xf32>
    %83 = arith.negf %82 : vector<8x128xf32>
    %84 = math.exp %83 : vector<8x128xf32>
    %cst_27 = arith.constant 1.000000e+00 : f32
    %85 = vector.broadcast %cst_27 : f32 to vector<8x128xf32>
    %86 = arith.addf %85, %84 : vector<8x128xf32>
    %87 = arith.divf %85, %86 : vector<8x128xf32>
    %88 = vector.extract_strided_slice %81 {offsets = [0, 128], sizes = [8, 128], strides = [1, 1]} : vector<8x512xf32> to vector<8x128xf32>
    %89 = arith.negf %88 : vector<8x128xf32>
    %90 = math.exp %89 : vector<8x128xf32>
    %cst_28 = arith.constant 1.000000e+00 : f32
    %91 = vector.broadcast %cst_28 : f32 to vector<8x128xf32>
    %92 = arith.addf %91, %90 : vector<8x128xf32>
    %93 = arith.divf %91, %92 : vector<8x128xf32>
    %94 = vector.extract_strided_slice %81 {offsets = [0, 256], sizes = [8, 128], strides = [1, 1]} : vector<8x512xf32> to vector<8x128xf32>
    %95 = math.tanh %94 : vector<8x128xf32>
    %96 = vector.extract_strided_slice %81 {offsets = [0, 384], sizes = [8, 128], strides = [1, 1]} : vector<8x512xf32> to vector<8x128xf32>
    %97 = arith.negf %96 : vector<8x128xf32>
    %98 = math.exp %97 : vector<8x128xf32>
    %cst_29 = arith.constant 1.000000e+00 : f32
    %99 = vector.broadcast %cst_29 : f32 to vector<8x128xf32>
    %100 = arith.addf %99, %98 : vector<8x128xf32>
    %101 = arith.divf %99, %100 : vector<8x128xf32>
    %102 = arith.mulf %93, %69 : vector<8x128xf32>
    %103 = arith.mulf %87, %95 : vector<8x128xf32>
    %104 = arith.addf %102, %103 : vector<8x128xf32>
    %105 = math.tanh %104 : vector<8x128xf32>
    %106 = arith.mulf %101, %105 : vector<8x128xf32>
    %107 = arith.truncf %106 : vector<8x128xf32> to vector<8x128xbf16>
    %c2_30 = arith.constant 2 : index
    %c0_31 = arith.constant 0 : index
    %c0_32 = arith.constant 0 : index
    %108 = vector.load %arg4[%c2_30, %c0_31, %c0_32] : memref<8x8x128xbf16, #tpu.memory_space<vmem>>, vector<1x8x128xbf16>
    %109 = vector.shape_cast %108 : vector<1x8x128xbf16> to vector<8x128xbf16>
    %110 = vector.shape_cast %107 : vector<8x128xbf16> to vector<1x8x128xbf16>
    tpu.vector_store %arg4[%c2_30, %c0_31, %c0_32], %110 {strides = array<i32>} : memref<8x8x128xbf16, #tpu.memory_space<vmem>>, vector<1x8x128xbf16>,
    %111 = arith.truncf %106 : vector<8x128xf32> to vector<8x128xbf16>
    %cst_33 = arith.constant dense<0.000000e+00> : vector<8x512xf32>
    %112 = tpu.matmul %111, %3, %cst_33 {dimension_numbers = #tpu.dot_dimension_numbers<[1], [0], [0], [1], [0, 0, 1, 1], [], []>} : vector<8x128xbf16>, vector<128x512xbf16>, vector<8x512xf32> -> vector<8x512xf32>
    %c3 = arith.constant 3 : index
    %c0_34 = arith.constant 0 : index
    %c0_35 = arith.constant 0 : index
    %113 = vector.load %arg2[%c3, %c0_34, %c0_35] : memref<8x8x512xbf16, #tpu.memory_space<vmem>>, vector<1x8x512xbf16>
    %114 = vector.shape_cast %113 : vector<1x8x512xbf16> to vector<8x512xbf16>
    %115 = arith.extf %114 : vector<8x512xbf16> to vector<8x512xf32>
    %116 = arith.addf %112, %115 : vector<8x512xf32>
    %117 = vector.extract_strided_slice %116 {offsets = [0, 0], sizes = [8, 128], strides = [1, 1]} : vector<8x512xf32> to vector<8x128xf32>
    %118 = arith.negf %117 : vector<8x128xf32>
    %119 = math.exp %118 : vector<8x128xf32>
    %cst_36 = arith.constant 1.000000e+00 : f32
    %120 = vector.broadcast %cst_36 : f32 to vector<8x128xf32>
    %121 = arith.addf %120, %119 : vector<8x128xf32>
    %122 = arith.divf %120, %121 : vector<8x128xf32>
    %123 = vector.extract_strided_slice %116 {offsets = [0, 128], sizes = [8, 128], strides = [1, 1]} : vector<8x512xf32> to vector<8x128xf32>
    %124 = arith.negf %123 : vector<8x128xf32>
    %125 = math.exp %124 : vector<8x128xf32>
    %cst_37 = arith.constant 1.000000e+00 : f32
    %126 = vector.broadcast %cst_37 : f32 to vector<8x128xf32>
    %127 = arith.addf %126, %125 : vector<8x128xf32>
    %128 = arith.divf %126, %127 : vector<8x128xf32>
    %129 = vector.extract_strided_slice %116 {offsets = [0, 256], sizes = [8, 128], strides = [1, 1]} : vector<8x512xf32> to vector<8x128xf32>
    %130 = math.tanh %129 : vector<8x128xf32>
    %131 = vector.extract_strided_slice %116 {offsets = [0, 384], sizes = [8, 128], strides = [1, 1]} : vector<8x512xf32> to vector<8x128xf32>
    %132 = arith.negf %131 : vector<8x128xf32>
    %133 = math.exp %132 : vector<8x128xf32>
    %cst_38 = arith.constant 1.000000e+00 : f32
    %134 = vector.broadcast %cst_38 : f32 to vector<8x128xf32>
    %135 = arith.addf %134, %133 : vector<8x128xf32>
    %136 = arith.divf %134, %135 : vector<8x128xf32>
    %137 = arith.mulf %128, %104 : vector<8x128xf32>
    %138 = arith.mulf %122, %130 : vector<8x128xf32>
    %139 = arith.addf %137, %138 : vector<8x128xf32>
    %140 = math.tanh %139 : vector<8x128xf32>
    %141 = arith.mulf %136, %140 : vector<8x128xf32>
    %142 = arith.truncf %141 : vector<8x128xf32> to vector<8x128xbf16>
    %c3_39 = arith.constant 3 : index
    %c0_40 = arith.constant 0 : index
    %c0_41 = arith.constant 0 : index
    %143 = vector.load %arg4[%c3_39, %c0_40, %c0_41] : memref<8x8x128xbf16, #tpu.memory_space<vmem>>, vector<1x8x128xbf16>
    %144 = vector.shape_cast %143 : vector<1x8x128xbf16> to vector<8x128xbf16>
    %145 = vector.shape_cast %142 : vector<8x128xbf16> to vector<1x8x128xbf16>
    tpu.vector_store %arg4[%c3_39, %c0_40, %c0_41], %145 {strides = array<i32>} : memref<8x8x128xbf16, #tpu.memory_space<vmem>>, vector<1x8x128xbf16>,
    %146 = arith.truncf %141 : vector<8x128xf32> to vector<8x128xbf16>
    %cst_42 = arith.constant dense<0.000000e+00> : vector<8x512xf32>
    %147 = tpu.matmul %146, %3, %cst_42 {dimension_numbers = #tpu.dot_dimension_numbers<[1], [0], [0], [1], [0, 0, 1, 1], [], []>} : vector<8x128xbf16>, vector<128x512xbf16>, vector<8x512xf32> -> vector<8x512xf32>
    %c4 = arith.constant 4 : index
    %c0_43 = arith.constant 0 : index
    %c0_44 = arith.constant 0 : index
    %148 = vector.load %arg2[%c4, %c0_43, %c0_44] : memref<8x8x512xbf16, #tpu.memory_space<vmem>>, vector<1x8x512xbf16>
    %149 = vector.shape_cast %148 : vector<1x8x512xbf16> to vector<8x512xbf16>
    %150 = arith.extf %149 : vector<8x512xbf16> to vector<8x512xf32>
    %151 = arith.addf %147, %150 : vector<8x512xf32>
    %152 = vector.extract_strided_slice %151 {offsets = [0, 0], sizes = [8, 128], strides = [1, 1]} : vector<8x512xf32> to vector<8x128xf32>
    %153 = arith.negf %152 : vector<8x128xf32>
    %154 = math.exp %153 : vector<8x128xf32>
    %cst_45 = arith.constant 1.000000e+00 : f32
    %155 = vector.broadcast %cst_45 : f32 to vector<8x128xf32>
    %156 = arith.addf %155, %154 : vector<8x128xf32>
    %157 = arith.divf %155, %156 : vector<8x128xf32>
    %158 = vector.extract_strided_slice %151 {offsets = [0, 128], sizes = [8, 128], strides = [1, 1]} : vector<8x512xf32> to vector<8x128xf32>
    %159 = arith.negf %158 : vector<8x128xf32>
    %160 = math.exp %159 : vector<8x128xf32>
    %cst_46 = arith.constant 1.000000e+00 : f32
    %161 = vector.broadcast %cst_46 : f32 to vector<8x128xf32>
    %162 = arith.addf %161, %160 : vector<8x128xf32>
    %163 = arith.divf %161, %162 : vector<8x128xf32>
    %164 = vector.extract_strided_slice %151 {offsets = [0, 256], sizes = [8, 128], strides = [1, 1]} : vector<8x512xf32> to vector<8x128xf32>
    %165 = math.tanh %164 : vector<8x128xf32>
    %166 = vector.extract_strided_slice %151 {offsets = [0, 384], sizes = [8, 128], strides = [1, 1]} : vector<8x512xf32> to vector<8x128xf32>
    %167 = arith.negf %166 : vector<8x128xf32>
    %168 = math.exp %167 : vector<8x128xf32>
    %cst_47 = arith.constant 1.000000e+00 : f32
    %169 = vector.broadcast %cst_47 : f32 to vector<8x128xf32>
    %170 = arith.addf %169, %168 : vector<8x128xf32>
    %171 = arith.divf %169, %170 : vector<8x128xf32>
    %172 = arith.mulf %163, %139 : vector<8x128xf32>
    %173 = arith.mulf %157, %165 : vector<8x128xf32>
    %174 = arith.addf %172, %173 : vector<8x128xf32>
    %175 = math.tanh %174 : vector<8x128xf32>
    %176 = arith.mulf %171, %175 : vector<8x128xf32>
    %177 = arith.truncf %176 : vector<8x128xf32> to vector<8x128xbf16>
    %c4_48 = arith.constant 4 : index
    %c0_49 = arith.constant 0 : index
    %c0_50 = arith.constant 0 : index
    %178 = vector.load %arg4[%c4_48, %c0_49, %c0_50] : memref<8x8x128xbf16, #tpu.memory_space<vmem>>, vector<1x8x128xbf16>
    %179 = vector.shape_cast %178 : vector<1x8x128xbf16> to vector<8x128xbf16>
    %180 = vector.shape_cast %177 : vector<8x128xbf16> to vector<1x8x128xbf16>
    tpu.vector_store %arg4[%c4_48, %c0_49, %c0_50], %180 {strides = array<i32>} : memref<8x8x128xbf16, #tpu.memory_space<vmem>>, vector<1x8x128xbf16>,
    %181 = arith.truncf %176 : vector<8x128xf32> to vector<8x128xbf16>
    %cst_51 = arith.constant dense<0.000000e+00> : vector<8x512xf32>
    %182 = tpu.matmul %181, %3, %cst_51 {dimension_numbers = #tpu.dot_dimension_numbers<[1], [0], [0], [1], [0, 0, 1, 1], [], []>} : vector<8x128xbf16>, vector<128x512xbf16>, vector<8x512xf32> -> vector<8x512xf32>
    %c5 = arith.constant 5 : index
    %c0_52 = arith.constant 0 : index
    %c0_53 = arith.constant 0 : index
    %183 = vector.load %arg2[%c5, %c0_52, %c0_53] : memref<8x8x512xbf16, #tpu.memory_space<vmem>>, vector<1x8x512xbf16>
    %184 = vector.shape_cast %183 : vector<1x8x512xbf16> to vector<8x512xbf16>
    %185 = arith.extf %184 : vector<8x512xbf16> to vector<8x512xf32>
    %186 = arith.addf %182, %185 : vector<8x512xf32>
    %187 = vector.extract_strided_slice %186 {offsets = [0, 0], sizes = [8, 128], strides = [1, 1]} : vector<8x512xf32> to vector<8x128xf32>
    %188 = arith.negf %187 : vector<8x128xf32>
    %189 = math.exp %188 : vector<8x128xf32>
    %cst_54 = arith.constant 1.000000e+00 : f32
    %190 = vector.broadcast %cst_54 : f32 to vector<8x128xf32>
    %191 = arith.addf %190, %189 : vector<8x128xf32>
    %192 = arith.divf %190, %191 : vector<8x128xf32>
    %193 = vector.extract_strided_slice %186 {offsets = [0, 128], sizes = [8, 128], strides = [1, 1]} : vector<8x512xf32> to vector<8x128xf32>
    %194 = arith.negf %193 : vector<8x128xf32>
    %195 = math.exp %194 : vector<8x128xf32>
    %cst_55 = arith.constant 1.000000e+00 : f32
    %196 = vector.broadcast %cst_55 : f32 to vector<8x128xf32>
    %197 = arith.addf %196, %195 : vector<8x128xf32>
    %198 = arith.divf %196, %197 : vector<8x128xf32>
    %199 = vector.extract_strided_slice %186 {offsets = [0, 256], sizes = [8, 128], strides = [1, 1]} : vector<8x512xf32> to vector<8x128xf32>
    %200 = math.tanh %199 : vector<8x128xf32>
    %201 = vector.extract_strided_slice %186 {offsets = [0, 384], sizes = [8, 128], strides = [1, 1]} : vector<8x512xf32> to vector<8x128xf32>
    %202 = arith.negf %201 : vector<8x128xf32>
    %203 = math.exp %202 : vector<8x128xf32>
    %cst_56 = arith.constant 1.000000e+00 : f32
    %204 = vector.broadcast %cst_56 : f32 to vector<8x128xf32>
    %205 = arith.addf %204, %203 : vector<8x128xf32>
    %206 = arith.divf %204, %205 : vector<8x128xf32>
    %207 = arith.mulf %198, %174 : vector<8x128xf32>
    %208 = arith.mulf %192, %200 : vector<8x128xf32>
    %209 = arith.addf %207, %208 : vector<8x128xf32>
    %210 = math.tanh %209 : vector<8x128xf32>
    %211 = arith.mulf %206, %210 : vector<8x128xf32>
    %212 = arith.truncf %211 : vector<8x128xf32> to vector<8x128xbf16>
    %c5_57 = arith.constant 5 : index
    %c0_58 = arith.constant 0 : index
    %c0_59 = arith.constant 0 : index
    %213 = vector.load %arg4[%c5_57, %c0_58, %c0_59] : memref<8x8x128xbf16, #tpu.memory_space<vmem>>, vector<1x8x128xbf16>
    %214 = vector.shape_cast %213 : vector<1x8x128xbf16> to vector<8x128xbf16>
    %215 = vector.shape_cast %212 : vector<8x128xbf16> to vector<1x8x128xbf16>
    tpu.vector_store %arg4[%c5_57, %c0_58, %c0_59], %215 {strides = array<i32>} : memref<8x8x128xbf16, #tpu.memory_space<vmem>>, vector<1x8x128xbf16>,
    %216 = arith.truncf %211 : vector<8x128xf32> to vector<8x128xbf16>
    %cst_60 = arith.constant dense<0.000000e+00> : vector<8x512xf32>
    %217 = tpu.matmul %216, %3, %cst_60 {dimension_numbers = #tpu.dot_dimension_numbers<[1], [0], [0], [1], [0, 0, 1, 1], [], []>} : vector<8x128xbf16>, vector<128x512xbf16>, vector<8x512xf32> -> vector<8x512xf32>
    %c6 = arith.constant 6 : index
    %c0_61 = arith.constant 0 : index
    %c0_62 = arith.constant 0 : index
    %218 = vector.load %arg2[%c6, %c0_61, %c0_62] : memref<8x8x512xbf16, #tpu.memory_space<vmem>>, vector<1x8x512xbf16>
    %219 = vector.shape_cast %218 : vector<1x8x512xbf16> to vector<8x512xbf16>
    %220 = arith.extf %219 : vector<8x512xbf16> to vector<8x512xf32>
    %221 = arith.addf %217, %220 : vector<8x512xf32>
    %222 = vector.extract_strided_slice %221 {offsets = [0, 0], sizes = [8, 128], strides = [1, 1]} : vector<8x512xf32> to vector<8x128xf32>
    %223 = arith.negf %222 : vector<8x128xf32>
    %224 = math.exp %223 : vector<8x128xf32>
    %cst_63 = arith.constant 1.000000e+00 : f32
    %225 = vector.broadcast %cst_63 : f32 to vector<8x128xf32>
    %226 = arith.addf %225, %224 : vector<8x128xf32>
    %227 = arith.divf %225, %226 : vector<8x128xf32>
    %228 = vector.extract_strided_slice %221 {offsets = [0, 128], sizes = [8, 128], strides = [1, 1]} : vector<8x512xf32> to vector<8x128xf32>
    %229 = arith.negf %228 : vector<8x128xf32>
    %230 = math.exp %229 : vector<8x128xf32>
    %cst_64 = arith.constant 1.000000e+00 : f32
    %231 = vector.broadcast %cst_64 : f32 to vector<8x128xf32>
    %232 = arith.addf %231, %230 : vector<8x128xf32>
    %233 = arith.divf %231, %232 : vector<8x128xf32>
    %234 = vector.extract_strided_slice %221 {offsets = [0, 256], sizes = [8, 128], strides = [1, 1]} : vector<8x512xf32> to vector<8x128xf32>
    %235 = math.tanh %234 : vector<8x128xf32>
    %236 = vector.extract_strided_slice %221 {offsets = [0, 384], sizes = [8, 128], strides = [1, 1]} : vector<8x512xf32> to vector<8x128xf32>
    %237 = arith.negf %236 : vector<8x128xf32>
    %238 = math.exp %237 : vector<8x128xf32>
    %cst_65 = arith.constant 1.000000e+00 : f32
    %239 = vector.broadcast %cst_65 : f32 to vector<8x128xf32>
    %240 = arith.addf %239, %238 : vector<8x128xf32>
    %241 = arith.divf %239, %240 : vector<8x128xf32>
    %242 = arith.mulf %233, %209 : vector<8x128xf32>
    %243 = arith.mulf %227, %235 : vector<8x128xf32>
    %244 = arith.addf %242, %243 : vector<8x128xf32>
    %245 = math.tanh %244 : vector<8x128xf32>
    %246 = arith.mulf %241, %245 : vector<8x128xf32>
    %247 = arith.truncf %246 : vector<8x128xf32> to vector<8x128xbf16>
    %c6_66 = arith.constant 6 : index
    %c0_67 = arith.constant 0 : index
    %c0_68 = arith.constant 0 : index
    %248 = vector.load %arg4[%c6_66, %c0_67, %c0_68] : memref<8x8x128xbf16, #tpu.memory_space<vmem>>, vector<1x8x128xbf16>
    %249 = vector.shape_cast %248 : vector<1x8x128xbf16> to vector<8x128xbf16>
    %250 = vector.shape_cast %247 : vector<8x128xbf16> to vector<1x8x128xbf16>
    tpu.vector_store %arg4[%c6_66, %c0_67, %c0_68], %250 {strides = array<i32>} : memref<8x8x128xbf16, #tpu.memory_space<vmem>>, vector<1x8x128xbf16>,
    %251 = arith.truncf %246 : vector<8x128xf32> to vector<8x128xbf16>
    %cst_69 = arith.constant dense<0.000000e+00> : vector<8x512xf32>
    %252 = tpu.matmul %251, %3, %cst_69 {dimension_numbers = #tpu.dot_dimension_numbers<[1], [0], [0], [1], [0, 0, 1, 1], [], []>} : vector<8x128xbf16>, vector<128x512xbf16>, vector<8x512xf32> -> vector<8x512xf32>
    %c7 = arith.constant 7 : index
    %c0_70 = arith.constant 0 : index
    %c0_71 = arith.constant 0 : index
    %253 = vector.load %arg2[%c7, %c0_70, %c0_71] : memref<8x8x512xbf16, #tpu.memory_space<vmem>>, vector<1x8x512xbf16>
    %254 = vector.shape_cast %253 : vector<1x8x512xbf16> to vector<8x512xbf16>
    %255 = arith.extf %254 : vector<8x512xbf16> to vector<8x512xf32>
    %256 = arith.addf %252, %255 : vector<8x512xf32>
    %257 = vector.extract_strided_slice %256 {offsets = [0, 0], sizes = [8, 128], strides = [1, 1]} : vector<8x512xf32> to vector<8x128xf32>
    %258 = arith.negf %257 : vector<8x128xf32>
    %259 = math.exp %258 : vector<8x128xf32>
    %cst_72 = arith.constant 1.000000e+00 : f32
    %260 = vector.broadcast %cst_72 : f32 to vector<8x128xf32>
    %261 = arith.addf %260, %259 : vector<8x128xf32>
    %262 = arith.divf %260, %261 : vector<8x128xf32>
    %263 = vector.extract_strided_slice %256 {offsets = [0, 128], sizes = [8, 128], strides = [1, 1]} : vector<8x512xf32> to vector<8x128xf32>
    %264 = arith.negf %263 : vector<8x128xf32>
    %265 = math.exp %264 : vector<8x128xf32>
    %cst_73 = arith.constant 1.000000e+00 : f32
    %266 = vector.broadcast %cst_73 : f32 to vector<8x128xf32>
    %267 = arith.addf %266, %265 : vector<8x128xf32>
    %268 = arith.divf %266, %267 : vector<8x128xf32>
    %269 = vector.extract_strided_slice %256 {offsets = [0, 256], sizes = [8, 128], strides = [1, 1]} : vector<8x512xf32> to vector<8x128xf32>
    %270 = math.tanh %269 : vector<8x128xf32>
    %271 = vector.extract_strided_slice %256 {offsets = [0, 384], sizes = [8, 128], strides = [1, 1]} : vector<8x512xf32> to vector<8x128xf32>
    %272 = arith.negf %271 : vector<8x128xf32>
    %273 = math.exp %272 : vector<8x128xf32>
    %cst_74 = arith.constant 1.000000e+00 : f32
    %274 = vector.broadcast %cst_74 : f32 to vector<8x128xf32>
    %275 = arith.addf %274, %273 : vector<8x128xf32>
    %276 = arith.divf %274, %275 : vector<8x128xf32>
    %277 = arith.mulf %268, %244 : vector<8x128xf32>
    %278 = arith.mulf %262, %270 : vector<8x128xf32>
    %279 = arith.addf %277, %278 : vector<8x128xf32>
    %280 = math.tanh %279 : vector<8x128xf32>
    %281 = arith.mulf %276, %280 : vector<8x128xf32>
    %282 = arith.truncf %281 : vector<8x128xf32> to vector<8x128xbf16>
    %c7_75 = arith.constant 7 : index
    %c0_76 = arith.constant 0 : index
    %c0_77 = arith.constant 0 : index
    %283 = vector.load %arg4[%c7_75, %c0_76, %c0_77] : memref<8x8x128xbf16, #tpu.memory_space<vmem>>, vector<1x8x128xbf16>
    %284 = vector.shape_cast %283 : vector<1x8x128xbf16> to vector<8x128xbf16>
    %285 = vector.shape_cast %282 : vector<8x128xbf16> to vector<1x8x128xbf16>
    tpu.vector_store %arg4[%c7_75, %c0_76, %c0_77], %285 {strides = array<i32>} : memref<8x8x128xbf16, #tpu.memory_space<vmem>>, vector<1x8x128xbf16>,
    %c0_78 = arith.constant 0 : index
    %c0_79 = arith.constant 0 : index
    %286 = vector.load %arg5[%c0_78, %c0_79] : memref<8x128xf32, #tpu.memory_space<vmem>>, vector<8x128xf32>
    tpu.vector_store %arg5[%c0_78, %c0_79], %281 {strides = array<i32>} : memref<8x128xf32, #tpu.memory_space<vmem>>, vector<8x128xf32>,
    %c0_80 = arith.constant 0 : index
    %c0_81 = arith.constant 0 : index
    %287 = vector.load %arg6[%c0_80, %c0_81] : memref<8x128xf32, #tpu.memory_space<vmem>>, vector<8x128xf32>
    tpu.vector_store %arg6[%c0_80, %c0_81], %279 {strides = array<i32>} : memref<8x128xf32, #tpu.memory_space<vmem>>, vector<8x128xf32>,
    return
  }
  func.func @transform_0(%arg0: i32, %arg1: i32) -> (i32, i32, i32) {
    %c0_i32 = arith.constant 0 : i32
    %c0_i32_0 = arith.constant 0 : i32
    return %arg1, %arg0, %c0_i32 : i32, i32, i32
  }
  func.func @transform_1(%arg0: i32, %arg1: i32) -> (i32, i32) {
    %c0_i32 = arith.constant 0 : i32
    %c0_i32_0 = arith.constant 0 : i32
    %c0_i32_1 = arith.constant 0 : i32
    return %c0_i32, %c0_i32_0 : i32, i32
  }
  func.func @transform_2(%arg0: i32, %arg1: i32) -> (i32, i32, i32) {
    %c0_i32 = arith.constant 0 : i32
    %c0_i32_0 = arith.constant 0 : i32
    return %arg1, %arg0, %c0_i32 : i32, i32, i32
  }
}

</mosaic_0001>

<bundles_post_ra>
// kernel: lstm_encoder_forward.1
= control target key start
LH: loop header
LB: loop body
LE: loop exit
PB: predicated region body
PF: predicated region fallthrough
CT: control target
= control target key end

     0   :  { %v1432_v1 = vmov 0   ;;  %v1433_v33 = vmov 0.0|0.0   ;;  %s2041_s1 = inlined_call_operand.vmem [shape: bf16[128,512], index: 1, kind: input, shape index: {}]   ;;  %s2042_s0 = inlined_call_operand.vmem [shape: bf16[8,8,512], index: 0, kind: input, shape index: {}]   ;;  %s2043_s2 = inlined_call_operand.vmem [shape: bf16[8,8,128], index: 2, kind: output, shape index: {}]  }
   0x1   :  { %v1452_v0 = vld [vmem:[%s2041_s1 + $0x4] ss:$16 sps:$4 sm:$0xff]   ;;  %251 = vmatprep.mubr.bf16.mxu0 %v1432_v1  ;;  %292 = vmatprep.mubr.bf16.mxu1 %v1432_v1  ;;  %v1459_v2 = vld [vmem:[%s2041_s1] ss:$16 sps:$4 sm:$0xff]   ;;  %v1482_v6 = vld [vmem:[%s2041_s1 + $0xc] ss:$16 sps:$4 sm:$0xff]  }
   0x2   :  { %219 = vmatprep.subr.bf16.mxu0 %v1452_v0  ;;  %v1465_v3 = vld [vmem:[%s2041_s1 + $0x24] ss:$16 sps:$4 sm:$0xff]   ;;  %v1471_v4 = vld [vmem:[%s2041_s1 + $0x20] ss:$16 sps:$4 sm:$0xff]   ;;  %v1487_v7 = vld [vmem:[%s2041_s1 + $0x8] ss:$16 sps:$4 sm:$0xff]   ;;  %260 = vmatprep.subr.bf16.mxu1 %v1482_v6 }
   0x3   :  { %220 = vmatpush1.bf16.msra.mxu0 %v1459_v2  ;;  %v1477_v5 = vld [vmem:[%s2041_s1 + $0x44] ss:$16 sps:$4 sm:$0xff]   ;;  %v1493_v8 = vld [vmem:[%s2041_s1 + $0x40] ss:$16 sps:$4 sm:$0xff]   ;;  %261 = vmatpush1.bf16.msra.mxu1 %v1487_v7  ;;  %v1506_v10 = vld [vmem:[%s2041_s1 + $0x2c] ss:$16 sps:$4 sm:$0xff]  }
   0x4   :  { %221 = vmatprep.subr.bf16.mxu0 %v1465_v3  ;;  %v1500_v9 = vld [vmem:[%s2041_s1 + $0x64] ss:$16 sps:$4 sm:$0xff]   ;;  %v1511_v11 = vld [vmem:[%s2041_s1 + $0x28] ss:$16 sps:$4 sm:$0xff]   ;;  %262 = vmatprep.subr.bf16.mxu1 %v1506_v10  ;;  %v1518_v12 = vld [vmem:[%s2041_s1 + $0x60] ss:$16 sps:$4 sm:$0xff]  }
   0x5   :  { %v1523_v13 = vld [vmem:[%s2041_s1 + $0x84] ss:$16 sps:$4 sm:$0xff]   ;;  %v1528_v14 = vld [vmem:[%s2041_s1 + $0x4c] ss:$16 sps:$4 sm:$0xff]   ;;  %v1535_v15 = vld [vmem:[%s2041_s1 + $0x48] ss:$16 sps:$4 sm:$0xff]  }
   0x6   :  { %v1541_v16 = vld [vmem:[%s2041_s1 + $0x6c] ss:$16 sps:$4 sm:$0xff]   ;;  %v1547_v17 = vld [vmem:[%s2041_s1 + $0x80] ss:$16 sps:$4 sm:$0xff]   ;;  %v1553_v18 = vld [vmem:[%s2041_s1 + $0xa4] ss:$16 sps:$4 sm:$0xff]  }
   0x7   :  { %222 = vmatpush1.bf16.msra.mxu0 %v1471_v4  ;;  %263 = vmatpush1.bf16.msra.mxu1 %v1511_v11  ;;  %v1559_v19 = vld [vmem:[%s2041_s1 + $0x68] ss:$16 sps:$4 sm:$0xff]   ;;  %v1565_v20 = vld [vmem:[%s2041_s1 + $0x8c] ss:$16 sps:$4 sm:$0xff]   ;;  %v1571_v21 = vld [vmem:[%s2041_s1 + $0xa0] ss:$16 sps:$4 sm:$0xff]  }
   0x8   :  { %223 = vmatprep.subr.bf16.mxu0 %v1477_v5  ;;  %264 = vmatprep.subr.bf16.mxu1 %v1528_v14  ;;  %v1576_v22 = vld [vmem:[%s2041_s1 + $0xc4] ss:$16 sps:$4 sm:$0xff]   ;;  %v1583_v23 = vld [vmem:[%s2041_s1 + $0x88] ss:$16 sps:$4 sm:$0xff]   ;;  %v1589_v24 = vld [vmem:[%s2041_s1 + $0xac] ss:$16 sps:$4 sm:$0xff]  }
   0x9   :  { %v1595_v25 = vld [vmem:[%s2041_s1 + $0xc0] ss:$16 sps:$4 sm:$0xff]   ;;  %v1601_v26 = vld [vmem:[%s2041_s1 + $0xe4] ss:$16 sps:$4 sm:$0xff]   ;;  %v1607_v27 = vld [vmem:[%s2041_s1 + $0xa8] ss:$16 sps:$4 sm:$0xff]  }
   0xa   :  { %v1613_v28 = vld [vmem:[%s2041_s1 + $0xcc] ss:$16 sps:$4 sm:$0xff]   ;;  %v1619_v29 = vld [vmem:[%s2041_s1 + $0xe0] ss:$16 sps:$4 sm:$0xff]   ;;  %v1626_v30 = vld [vmem:[%s2041_s1 + $0xc8] ss:$16 sps:$4 sm:$0xff]  }
   0xb   :  { %224 = vmatpush1.bf16.msra.mxu0 %v1493_v8  ;;  %265 = vmatpush1.bf16.msra.mxu1 %v1535_v15  ;;  %v1632_v31 = vld [vmem:[%s2041_s1 + $0xec] ss:$16 sps:$4 sm:$0xff]   ;;  %v1639_v32 = vld [vmem:[%s2041_s1 + $0xe8] ss:$16 sps:$4 sm:$0xff]   ;;  %v53_v34 = vld [vmem:[%s2042_s0] sm:$0xff] }
   0xc   :  { %225 = vmatprep.subr.bf16.mxu0 %v1500_v9  ;;  %266 = vmatprep.subr.bf16.mxu1 %v1541_v16  ;;  %v55_v35 = vunpack.c.l.bf16 %v53_v34  ;;  %v56_v36 = vunpack.c.h.bf16 %v53_v34  ;;  %v54_v38 = vld [vmem:[%s2042_s0 + $0x8] sm:$0xff] }
   0xd   :  { %v58_v45 = vunpack.c.h.bf16 %v54_v38  ;;  %v57_v51 = vunpack.c.l.bf16 %v54_v38 }
   0xf   :  { %226 = vmatpush1.bf16.msra.mxu0 %v1518_v12  ;;  %267 = vmatpush1.bf16.msra.mxu1 %v1559_v19 }
  0x10   :  { %227 = vmatprep.subr.bf16.mxu0 %v1523_v13  ;;  %268 = vmatprep.subr.bf16.mxu1 %v1565_v20 }
  0x13   :  { %228 = vmatpush1.bf16.msra.mxu0 %v1547_v17  ;;  %269 = vmatpush1.bf16.msra.mxu1 %v1583_v23 }
  0x14   :  { %229 = vmatprep.subr.bf16.mxu0 %v1553_v18  ;;  %270 = vmatprep.subr.bf16.mxu1 %v1589_v24 }
  0x17   :  { %230 = vmatpush1.bf16.msra.mxu0 %v1571_v21  ;;  %271 = vmatpush1.bf16.msra.mxu1 %v1607_v27 }
  0x18   :  { %231 = vmatprep.subr.bf16.mxu0 %v1576_v22  ;;  %272 = vmatprep.subr.bf16.mxu1 %v1613_v28 }
  0x1b   :  { %232 = vmatpush1.bf16.msra.mxu0 %v1595_v25  ;;  %273 = vmatpush1.bf16.msra.mxu1 %v1626_v30 }
  0x1c   :  { %233 = vmatprep.subr.bf16.mxu0 %v1601_v26  ;;  %274 = vmatprep.subr.bf16.mxu1 %v1632_v31 }
  0x1f   :  { %234 = vmatpush1.bf16.msra.mxu0 %v1619_v29  ;;  %275 = vmatpush1.bf16.msra.mxu1 %v1639_v32 }
  0x20   :  { %334 = vmatprep.subr.bf16.mxu0 %v1452_v0  ;;  %375 = vmatprep.subr.bf16.mxu1 %v1482_v6 }
  0x22   :  { %252 = vmatmul.mubr.bf16.vlgmr.msra.gmra.mrb[0].mxu0 %v1433_v33  ;;  %293 = vmatmul.mubr.bf16.vlgmr.msra.gmra.mrb[0].mxu1 %v1433_v33 }
  0x23   :  { %335 = vmatpush1.bf16.msra.mxu0 %v1459_v2  ;;  %366 = vmatprep.mubr.bf16.mxu0 %v1432_v1 }
  0x24   :  { %336 = vmatprep.subr.bf16.mxu0 %v1465_v3  ;;  %376 = vmatpush1.bf16.msra.mxu1 %v1487_v7 }
  0x25   :  { %377 = vmatprep.subr.bf16.mxu1 %v1506_v10  ;;  %407 = vmatprep.mubr.bf16.mxu1 %v1432_v1 }
  0x27   :  { %337 = vmatpush1.bf16.msra.mxu0 %v1471_v4 }
  0x28   :  { %338 = vmatprep.subr.bf16.mxu0 %v1477_v5  ;;  %378 = vmatpush1.bf16.msra.mxu1 %v1511_v11 }
  0x29   :  { %379 = vmatprep.subr.bf16.mxu1 %v1528_v14 }
  0x2b   :  { %339 = vmatpush1.bf16.msra.mxu0 %v1493_v8 }
  0x2c   :  { %340 = vmatprep.subr.bf16.mxu0 %v1500_v9  ;;  %380 = vmatpush1.bf16.msra.mxu1 %v1535_v15 }
  0x2d   :  { %381 = vmatprep.subr.bf16.mxu1 %v1541_v16 }
  0x2f   :  { %341 = vmatpush1.bf16.msra.mxu0 %v1518_v12 }
  0x30   :  { %342 = vmatprep.subr.bf16.mxu0 %v1523_v13  ;;  %382 = vmatpush1.bf16.msra.mxu1 %v1559_v19 }
  0x31   :  { %383 = vmatprep.subr.bf16.mxu1 %v1565_v20 }
  0x33   :  { %343 = vmatpush1.bf16.msra.mxu0 %v1547_v17 }
  0x34   :  { %344 = vmatprep.subr.bf16.mxu0 %v1553_v18  ;;  %384 = vmatpush1.bf16.msra.mxu1 %v1583_v23 }
  0x35   :  { %385 = vmatprep.subr.bf16.mxu1 %v1589_v24 }
  0x37   :  { %345 = vmatpush1.bf16.msra.mxu0 %v1571_v21 }
  0x38   :  { %346 = vmatprep.subr.bf16.mxu0 %v1576_v22  ;;  %386 = vmatpush1.bf16.msra.mxu1 %v1607_v27 }
  0x39   :  { %387 = vmatprep.subr.bf16.mxu1 %v1613_v28 }
  0x3b   :  { %347 = vmatpush1.bf16.msra.mxu0 %v1595_v25 }
  0x3c   :  { %348 = vmatprep.subr.bf16.mxu0 %v1601_v26  ;;  %388 = vmatpush1.bf16.msra.mxu1 %v1626_v30 }
  0x3d   :  { %389 = vmatprep.subr.bf16.mxu1 %v1632_v31 }
  0x3f   :  { %349 = vmatpush1.bf16.msra.mxu0 %v1619_v29 }
  0x40   :  { %450 = vmatprep.subr.bf16.mxu0 %v1452_v0  ;;  %390 = vmatpush1.bf16.msra.mxu1 %v1639_v32 }
  0x41   :  { %491 = vmatprep.subr.bf16.mxu1 %v1482_v6 }
  0xf5   :  { %v253_v37 = vpop.f32.mrb[0].mxu0  ;;  %v294_v47 = vpop.f32.mrb[0].mxu1 }
  0xf6   :  { %v254_v39 = vadd.f32 %v253_v37, %v55_v35  ;;  %v255_v40 = vpop.f32.mrb[1].mxu0  ;;  %v296_v48 = vpop.f32.mrb[1].mxu1  ;;  %v295_v54 = vadd.f32 %v294_v47, %v57_v51 }
  0xf7   :  { %v256_v41 = vadd.f32 %v255_v40, %v56_v36  ;;  %v257_v42 = vpop.f32.mrb[2].mxu0  ;;  %v297_v49 = vadd.f32 %v296_v48, %v58_v45  ;;  %v298_v50 = vpop.f32.mrb[2].mxu1  ;;  %v1180_v40 = vld [vmem:[%s2042_s0 + $0x10] sm:$0xff] }
  0xf8   :  { %v1177_v43 = vmul.f32 -1.442695, %v254_v39  ;;  %v258_v44 = vpop.f32.mrb[3].mxu0  ;;  %v299_v52 = vpop.f32.mrb[3].mxu1  ;;  %v331_v42 = vunpack.c.h.bf16 %v1180_v40 }
  0xf9   :  { %v1178_v46 = vmul.f32 -1.442695, %v256_v41  ;;  %v1179_v53 = vmul.f32 -1.442695, %v297_v49  ;;  %v330_v41 = vunpack.c.l.bf16 %v1180_v40 }
  0xfa   :  { %1272 = vpow2.f32 %v1177_v43 }
  0xfb   :  { %1274 = vpow2.f32 %v1178_v46  ;;  %v1181_v46 = vld [vmem:[%s2042_s0 + $0x18] sm:$0xff] }
  0xfc   :  { %1276 = vpow2.f32 %v1179_v53 }
  0xfd   :  { %1278 = vtanh.f32 %v295_v54 }
 0x104   :  { %v1273_v55 = vpop.eup %1272 }
 0x105   :  { %v1275_v56 = vpop.eup %1274  ;;  %v304_v57 = vadd.f32 1.0, %v1273_v55 }
 0x106   :  { %v310_v58 = vadd.f32 1.0, %v1275_v56  ;;  %v1277_v59 = vpop.eup %1276  ;;  %v333_v56 = vunpack.c.h.bf16 %v1181_v46 }
 0x107   :  { %1280 = vrcp.f32 %v304_v57  ;;  %v1279_v60 = vpop.eup %1278  ;;  %v317_v62 = vadd.f32 1.0, %v1277_v59 }
 0x108   :  { %1282 = vrcp.f32 %v310_v58  ;;  %v332_v58 = vunpack.c.l.bf16 %v1181_v46 }
 0x109   :  { %1284 = vrcp.f32 %v317_v62 }
 0x111   :  { %v1281_v61 = vpop.eup %1280 }
 0x112   :  { %v1283_v63 = vpop.eup %1282  ;;  %v321_v33 = vmul.f32 %v1281_v61, %v1279_v60 }
 0x113   :  { %v320_v34 = vmul.f32 0.0, %v1283_v63  ;;  %v1285_v36 = vpop.eup %1284 }
 0x115   :  { %v1685_v35 = vadd.f32 %v321_v33, %v320_v34 }
 0x117   :  { %1286 = vtanh.f32 %v1685_v35 }
 0x121   :  { %v1287_v37 = vpop.eup %1286 }
 0x122   :  { %v324_v38 = vmul.f32 %v1287_v37, %v1285_v36 }
 0x124   :  { %v325_v39 = vpack.c.bf16 %v324_v38, %v324_v38 }
 0x126   :  { %326 = vst [vmem:[%s2043_s2] sm:$0xf] %v325_v39  ;;  %367 = vmatmul.mubr.bf16.vlgmr.msra.gmra.mrb[4].mxu0 %v325_v39  ;;  %408 = vmatmul.mubr.bf16.vlgmr.msra.gmra.mrb[4].mxu1 %v325_v39 }
 0x127   :  { %451 = vmatpush1.bf16.msra.mxu0 %v1459_v2  ;;  %492 = vmatpush1.bf16.msra.mxu1 %v1487_v7 }
 0x128   :  { %452 = vmatprep.subr.bf16.mxu0 %v1465_v3  ;;  %493 = vmatprep.subr.bf16.mxu1 %v1506_v10 }
 0x129   :  { %482 = vmatprep.mubr.bf16.mxu0 %v1432_v1  ;;  %523 = vmatprep.mubr.bf16.mxu1 %v1432_v1 }
 0x12b   :  { %453 = vmatpush1.bf16.msra.mxu0 %v1471_v4  ;;  %494 = vmatpush1.bf16.msra.mxu1 %v1511_v11 }
 0x12c   :  { %454 = vmatprep.subr.bf16.mxu0 %v1477_v5  ;;  %495 = vmatprep.subr.bf16.mxu1 %v1528_v14 }
 0x12f   :  { %455 = vmatpush1.bf16.msra.mxu0 %v1493_v8  ;;  %496 = vmatpush1.bf16.msra.mxu1 %v1535_v15 }
 0x130   :  { %456 = vmatprep.subr.bf16.mxu0 %v1500_v9  ;;  %497 = vmatprep.subr.bf16.mxu1 %v1541_v16 }
 0x133   :  { %457 = vmatpush1.bf16.msra.mxu0 %v1518_v12  ;;  %498 = vmatpush1.bf16.msra.mxu1 %v1559_v19 }
 0x134   :  { %458 = vmatprep.subr.bf16.mxu0 %v1523_v13  ;;  %499 = vmatprep.subr.bf16.mxu1 %v1565_v20 }
 0x137   :  { %459 = vmatpush1.bf16.msra.mxu0 %v1547_v17  ;;  %500 = vmatpush1.bf16.msra.mxu1 %v1583_v23 }
 0x138   :  { %460 = vmatprep.subr.bf16.mxu0 %v1553_v18  ;;  %501 = vmatprep.subr.bf16.mxu1 %v1589_v24 }
 0x13b   :  { %461 = vmatpush1.bf16.msra.mxu0 %v1571_v21  ;;  %502 = vmatpush1.bf16.msra.mxu1 %v1607_v27 }
 0x13c   :  { %462 = vmatprep.subr.bf16.mxu0 %v1576_v22  ;;  %503 = vmatprep.subr.bf16.mxu1 %v1613_v28 }
 0x13f   :  { %463 = vmatpush1.bf16.msra.mxu0 %v1595_v25  ;;  %504 = vmatpush1.bf16.msra.mxu1 %v1626_v30 }
 0x140   :  { %464 = vmatprep.subr.bf16.mxu0 %v1601_v26  ;;  %505 = vmatprep.subr.bf16.mxu1 %v1632_v31 }
 0x143   :  { %465 = vmatpush1.bf16.msra.mxu0 %v1619_v29  ;;  %506 = vmatpush1.bf16.msra.mxu1 %v1639_v32 }
 0x144   :  { %566 = vmatprep.subr.bf16.mxu0 %v1452_v0  ;;  %607 = vmatprep.subr.bf16.mxu1 %v1482_v6 }
 0x1f9   :  { %v368_v43 = vpop.f32.mrb[4].mxu0  ;;  %v409_v44 = vpop.f32.mrb[4].mxu1 }
 0x1fa   :  { %v369_v45 = vadd.f32 %v368_v43, %v330_v41  ;;  %v370_v47 = vpop.f32.mrb[5].mxu0  ;;  %v411_v48 = vpop.f32.mrb[5].mxu1  ;;  %v410_v60 = vadd.f32 %v409_v44, %v332_v58 }
 0x1fb   :  { %v371_v49 = vadd.f32 %v370_v47, %v331_v42  ;;  %v372_v50 = vpop.f32.mrb[6].mxu0  ;;  %v413_v51 = vpop.f32.mrb[6].mxu1  ;;  %v412_v57 = vadd.f32 %v411_v48, %v333_v56 }
 0x1fc   :  { %v1182_v52 = vmul.f32 -1.442695, %v369_v45  ;;  %v373_v53 = vpop.f32.mrb[7].mxu0  ;;  %v414_v54 = vpop.f32.mrb[7].mxu1 }
 0x1fd   :  { %v1183_v55 = vmul.f32 -1.442695, %v371_v49  ;;  %v1184_v59 = vmul.f32 -1.442695, %v412_v57 }
 0x1fe   :  { %1288 = vpow2.f32 %v1182_v52  ;;  %v1187_v52 = vld [vmem:[%s2042_s0 + $0x28] sm:$0xff] }
 0x1ff   :  { %1290 = vpow2.f32 %v1183_v55 }
 0x200   :  { %1292 = vpow2.f32 %v1184_v59 }
 0x201   :  { %1294 = vtanh.f32 %v410_v60 }
 0x208   :  { %v1289_v61 = vpop.eup %1288 }
 0x209   :  { %v1291_v62 = vpop.eup %1290  ;;  %v419_v63 = vadd.f32 1.0, %v1289_v61 }
 0x20a   :  { %v425_v33 = vadd.f32 1.0, %v1291_v62  ;;  %v1293_v34 = vpop.eup %1292  ;;  %v449_v62 = vunpack.c.h.bf16 %v1187_v52 }
 0x20b   :  { %1296 = vrcp.f32 %v419_v63  ;;  %v1295_v36 = vpop.eup %1294  ;;  %v432_v40 = vadd.f32 1.0, %v1293_v34 }
 0x20c   :  { %1298 = vrcp.f32 %v425_v33  ;;  %v448_v33 = vunpack.c.l.bf16 %v1187_v52 }
 0x20d   :  { %1300 = vrcp.f32 %v432_v40 }
 0x215   :  { %v1297_v37 = vpop.eup %1296 }
 0x216   :  { %v1299_v38 = vpop.eup %1298  ;;  %v436_v39 = vmul.f32 %v1297_v37, %v1295_v36 }
 0x217   :  { %v435_v41 = vmul.f32 %v1299_v38, %v1685_v35  ;;  %v1301_v43 = vpop.eup %1300  ;;  %v1186_v35 = vld [vmem:[%s2042_s0 + $0x20] sm:$0xff] }
 0x218   :  { %v446_v47 = vunpack.c.l.bf16 %v1186_v35  ;;  %v447_v48 = vunpack.c.h.bf16 %v1186_v35 }
 0x219   :  { %v1732_v42 = vadd.f32 %v436_v39, %v435_v41 }
 0x21b   :  { %1302 = vtanh.f32 %v1732_v42 }
 0x225   :  { %v1303_v44 = vpop.eup %1302 }
 0x226   :  { %v439_v45 = vmul.f32 %v1303_v44, %v1301_v43 }
 0x228   :  { %v440_v46 = vpack.c.bf16 %v439_v45, %v439_v45 }
 0x22a   :  { %1185 = vst [vmem:[%s2043_s2 + $0x4] sm:$0xf] %v440_v46  ;;  %483 = vmatmul.mubr.bf16.vlgmr.msra.gmra.mrb[8].mxu0 %v440_v46  ;;  %524 = vmatmul.mubr.bf16.vlgmr.msra.gmra.mrb[8].mxu1 %v440_v46 }
 0x22b   :  { %567 = vmatpush1.bf16.msra.mxu0 %v1459_v2  ;;  %608 = vmatpush1.bf16.msra.mxu1 %v1487_v7 }
 0x22c   :  { %568 = vmatprep.subr.bf16.mxu0 %v1465_v3  ;;  %609 = vmatprep.subr.bf16.mxu1 %v1506_v10 }
 0x22d   :  { %598 = vmatprep.mubr.bf16.mxu0 %v1432_v1  ;;  %639 = vmatprep.mubr.bf16.mxu1 %v1432_v1 }
 0x22f   :  { %569 = vmatpush1.bf16.msra.mxu0 %v1471_v4  ;;  %610 = vmatpush1.bf16.msra.mxu1 %v1511_v11 }
 0x230   :  { %570 = vmatprep.subr.bf16.mxu0 %v1477_v5  ;;  %611 = vmatprep.subr.bf16.mxu1 %v1528_v14 }
 0x233   :  { %571 = vmatpush1.bf16.msra.mxu0 %v1493_v8  ;;  %612 = vmatpush1.bf16.msra.mxu1 %v1535_v15 }
 0x234   :  { %572 = vmatprep.subr.bf16.mxu0 %v1500_v9  ;;  %613 = vmatprep.subr.bf16.mxu1 %v1541_v16 }
 0x237   :  { %573 = vmatpush1.bf16.msra.mxu0 %v1518_v12  ;;  %614 = vmatpush1.bf16.msra.mxu1 %v1559_v19 }
 0x238   :  { %574 = vmatprep.subr.bf16.mxu0 %v1523_v13  ;;  %615 = vmatprep.subr.bf16.mxu1 %v1565_v20 }
 0x23b   :  { %575 = vmatpush1.bf16.msra.mxu0 %v1547_v17  ;;  %616 = vmatpush1.bf16.msra.mxu1 %v1583_v23 }
 0x23c   :  { %576 = vmatprep.subr.bf16.mxu0 %v1553_v18  ;;  %617 = vmatprep.subr.bf16.mxu1 %v1589_v24 }
 0x23f   :  { %577 = vmatpush1.bf16.msra.mxu0 %v1571_v21  ;;  %618 = vmatpush1.bf16.msra.mxu1 %v1607_v27 }
 0x240   :  { %578 = vmatprep.subr.bf16.mxu0 %v1576_v22  ;;  %619 = vmatprep.subr.bf16.mxu1 %v1613_v28 }
 0x243   :  { %579 = vmatpush1.bf16.msra.mxu0 %v1595_v25  ;;  %620 = vmatpush1.bf16.msra.mxu1 %v1626_v30 }
 0x244   :  { %580 = vmatprep.subr.bf16.mxu0 %v1601_v26  ;;  %621 = vmatprep.subr.bf16.mxu1 %v1632_v31 }
 0x247   :  { %581 = vmatpush1.bf16.msra.mxu0 %v1619_v29  ;;  %622 = vmatpush1.bf16.msra.mxu1 %v1639_v32 }
 0x248   :  { %682 = vmatprep.subr.bf16.mxu0 %v1452_v0  ;;  %723 = vmatprep.subr.bf16.mxu1 %v1482_v6 }
 0x2fd   :  { %v484_v49 = vpop.f32.mrb[8].mxu0  ;;  %v525_v50 = vpop.f32.mrb[8].mxu1 }
 0x2fe   :  { %v485_v51 = vadd.f32 %v484_v49, %v446_v47  ;;  %v486_v53 = vpop.f32.mrb[9].mxu0  ;;  %v527_v54 = vpop.f32.mrb[9].mxu1  ;;  %v526_v36 = vadd.f32 %v525_v50, %v448_v33 }
 0x2ff   :  { %v487_v55 = vadd.f32 %v486_v53, %v447_v48  ;;  %v488_v56 = vpop.f32.mrb[10].mxu0  ;;  %v529_v57 = vpop.f32.mrb[10].mxu1  ;;  %v528_v63 = vadd.f32 %v527_v54, %v449_v62 }
 0x300   :  { %v1188_v58 = vmul.f32 -1.442695, %v485_v51  ;;  %v489_v59 = vpop.f32.mrb[11].mxu0  ;;  %v530_v60 = vpop.f32.mrb[11].mxu1 }
 0x301   :  { %v1189_v61 = vmul.f32 -1.442695, %v487_v55  ;;  %v1190_v34 = vmul.f32 -1.442695, %v528_v63 }
 0x302   :  { %1304 = vpow2.f32 %v1188_v58  ;;  %v1193_v58 = vld [vmem:[%s2042_s0 + $0x38] sm:$0xff] }
 0x303   :  { %1306 = vpow2.f32 %v1189_v61 }
 0x304   :  { %1308 = vpow2.f32 %v1190_v34 }
 0x305   :  { %1310 = vtanh.f32 %v526_v36 }
 0x30c   :  { %v1305_v37 = vpop.eup %1304 }
 0x30d   :  { %v1307_v38 = vpop.eup %1306  ;;  %v535_v39 = vadd.f32 1.0, %v1305_v37 }
 0x30e   :  { %v541_v40 = vadd.f32 1.0, %v1307_v38  ;;  %v1309_v41 = vpop.eup %1308  ;;  %v565_v38 = vunpack.c.h.bf16 %v1193_v58 }
 0x30f   :  { %1312 = vrcp.f32 %v535_v39  ;;  %v1311_v43 = vpop.eup %1310  ;;  %v548_v35 = vadd.f32 1.0, %v1309_v41 }
 0x310   :  { %1314 = vrcp.f32 %v541_v40  ;;  %v564_v40 = vunpack.c.l.bf16 %v1193_v58 }
 0x311   :  { %1316 = vrcp.f32 %v548_v35 }
 0x319   :  { %v1313_v44 = vpop.eup %1312 }
 0x31a   :  { %v1315_v45 = vpop.eup %1314  ;;  %v552_v46 = vmul.f32 %v1313_v44, %v1311_v43 }
 0x31b   :  { %v551_v47 = vmul.f32 %v1315_v45, %v1732_v42  ;;  %v1317_v49 = vpop.eup %1316  ;;  %v1192_v42 = vld [vmem:[%s2042_s0 + $0x30] sm:$0xff] }
 0x31c   :  { %v562_v53 = vunpack.c.l.bf16 %v1192_v42  ;;  %v563_v54 = vunpack.c.h.bf16 %v1192_v42 }
 0x31d   :  { %v1779_v48 = vadd.f32 %v552_v46, %v551_v47 }
 0x31f   :  { %1318 = vtanh.f32 %v1779_v48 }
 0x329   :  { %v1319_v50 = vpop.eup %1318 }
 0x32a   :  { %v555_v51 = vmul.f32 %v1319_v50, %v1317_v49 }
 0x32c   :  { %v556_v52 = vpack.c.bf16 %v555_v51, %v555_v51 }
 0x32e   :  { %1191 = vst [vmem:[%s2043_s2 + $0x8] sm:$0xf] %v556_v52  ;;  %599 = vmatmul.mubr.bf16.vlgmr.msra.gmra.mrb[12].mxu0 %v556_v52  ;;  %640 = vmatmul.mubr.bf16.vlgmr.msra.gmra.mrb[12].mxu1 %v556_v52 }
 0x32f   :  { %683 = vmatpush1.bf16.msra.mxu0 %v1459_v2  ;;  %724 = vmatpush1.bf16.msra.mxu1 %v1487_v7 }
 0x330   :  { %684 = vmatprep.subr.bf16.mxu0 %v1465_v3  ;;  %725 = vmatprep.subr.bf16.mxu1 %v1506_v10 }
 0x331   :  { %714 = vmatprep.mubr.bf16.mxu0 %v1432_v1  ;;  %755 = vmatprep.mubr.bf16.mxu1 %v1432_v1 }
 0x333   :  { %685 = vmatpush1.bf16.msra.mxu0 %v1471_v4  ;;  %726 = vmatpush1.bf16.msra.mxu1 %v1511_v11 }
 0x334   :  { %686 = vmatprep.subr.bf16.mxu0 %v1477_v5  ;;  %727 = vmatprep.subr.bf16.mxu1 %v1528_v14 }
 0x337   :  { %687 = vmatpush1.bf16.msra.mxu0 %v1493_v8  ;;  %728 = vmatpush1.bf16.msra.mxu1 %v1535_v15 }
 0x338   :  { %688 = vmatprep.subr.bf16.mxu0 %v1500_v9  ;;  %729 = vmatprep.subr.bf16.mxu1 %v1541_v16 }
 0x33b   :  { %689 = vmatpush1.bf16.msra.mxu0 %v1518_v12  ;;  %730 = vmatpush1.bf16.msra.mxu1 %v1559_v19 }
 0x33c   :  { %690 = vmatprep.subr.bf16.mxu0 %v1523_v13  ;;  %731 = vmatprep.subr.bf16.mxu1 %v1565_v20 }
 0x33f   :  { %691 = vmatpush1.bf16.msra.mxu0 %v1547_v17  ;;  %732 = vmatpush1.bf16.msra.mxu1 %v1583_v23 }
 0x340   :  { %692 = vmatprep.subr.bf16.mxu0 %v1553_v18  ;;  %733 = vmatprep.subr.bf16.mxu1 %v1589_v24 }
 0x343   :  { %693 = vmatpush1.bf16.msra.mxu0 %v1571_v21  ;;  %734 = vmatpush1.bf16.msra.mxu1 %v1607_v27 }
 0x344   :  { %694 = vmatprep.subr.bf16.mxu0 %v1576_v22  ;;  %735 = vmatprep.subr.bf16.mxu1 %v1613_v28 }
 0x347   :  { %695 = vmatpush1.bf16.msra.mxu0 %v1595_v25  ;;  %736 = vmatpush1.bf16.msra.mxu1 %v1626_v30 }
 0x348   :  { %696 = vmatprep.subr.bf16.mxu0 %v1601_v26  ;;  %737 = vmatprep.subr.bf16.mxu1 %v1632_v31 }
 0x34b   :  { %697 = vmatpush1.bf16.msra.mxu0 %v1619_v29  ;;  %738 = vmatpush1.bf16.msra.mxu1 %v1639_v32 }
 0x34c   :  { %798 = vmatprep.subr.bf16.mxu0 %v1452_v0  ;;  %839 = vmatprep.subr.bf16.mxu1 %v1482_v6 }
 0x401   :  { %v600_v55 = vpop.f32.mrb[12].mxu0  ;;  %v641_v56 = vpop.f32.mrb[12].mxu1 }
 0x402   :  { %v601_v57 = vadd.f32 %v600_v55, %v562_v53  ;;  %v602_v59 = vpop.f32.mrb[13].mxu0  ;;  %v643_v60 = vpop.f32.mrb[13].mxu1  ;;  %v642_v43 = vadd.f32 %v641_v56, %v564_v40 }
 0x403   :  { %v603_v61 = vadd.f32 %v602_v59, %v563_v54  ;;  %v604_v62 = vpop.f32.mrb[14].mxu0  ;;  %v645_v63 = vpop.f32.mrb[14].mxu1  ;;  %v644_v39 = vadd.f32 %v643_v60, %v565_v38 }
 0x404   :  { %v1194_v33 = vmul.f32 -1.442695, %v601_v57  ;;  %v605_v34 = vpop.f32.mrb[15].mxu0  ;;  %v646_v36 = vpop.f32.mrb[15].mxu1 }
 0x405   :  { %v1195_v37 = vmul.f32 -1.442695, %v603_v61  ;;  %v1196_v41 = vmul.f32 -1.442695, %v644_v39 }
 0x406   :  { %1320 = vpow2.f32 %v1194_v33  ;;  %v1199_v33 = vld [vmem:[%s2042_s0 + $0x48] sm:$0xff] }
 0x407   :  { %1322 = vpow2.f32 %v1195_v37 }
 0x408   :  { %1324 = vpow2.f32 %v1196_v41 }
 0x409   :  { %1326 = vtanh.f32 %v642_v43  ;;  %v681_v43 = vunpack.c.h.bf16 %v1199_v33 }
 0x410   :  { %v1321_v44 = vpop.eup %1320 }
 0x411   :  { %v1323_v45 = vpop.eup %1322  ;;  %v651_v46 = vadd.f32 1.0, %v1321_v44 }
 0x412   :  { %v657_v35 = vadd.f32 1.0, %v1323_v45  ;;  %v1325_v47 = vpop.eup %1324  ;;  %v680_v45 = vunpack.c.l.bf16 %v1199_v33 }
 0x413   :  { %1328 = vrcp.f32 %v651_v46  ;;  %v1327_v49 = vpop.eup %1326  ;;  %v664_v42 = vadd.f32 1.0, %v1325_v47 }
 0x414   :  { %1330 = vrcp.f32 %v657_v35 }
 0x415   :  { %1332 = vrcp.f32 %v664_v42 }
 0x41d   :  { %v1329_v50 = vpop.eup %1328 }
 0x41e   :  { %v1331_v51 = vpop.eup %1330  ;;  %v668_v52 = vmul.f32 %v1329_v50, %v1327_v49 }
 0x41f   :  { %v667_v53 = vmul.f32 %v1331_v51, %v1779_v48  ;;  %v1333_v55 = vpop.eup %1332  ;;  %v1198_v48 = vld [vmem:[%s2042_s0 + $0x40] sm:$0xff] }
 0x420   :  { %v678_v59 = vunpack.c.l.bf16 %v1198_v48  ;;  %v679_v60 = vunpack.c.h.bf16 %v1198_v48 }
 0x421   :  { %v1826_v54 = vadd.f32 %v668_v52, %v667_v53 }
 0x423   :  { %1334 = vtanh.f32 %v1826_v54 }
 0x42d   :  { %v1335_v56 = vpop.eup %1334 }
 0x42e   :  { %v671_v57 = vmul.f32 %v1335_v56, %v1333_v55 }
 0x430   :  { %v672_v58 = vpack.c.bf16 %v671_v57, %v671_v57 }
 0x432   :  { %1197 = vst [vmem:[%s2043_s2 + $0xc] sm:$0xf] %v672_v58  ;;  %715 = vmatmul.mubr.bf16.vlgmr.msra.gmra.mrb[16].mxu0 %v672_v58  ;;  %756 = vmatmul.mubr.bf16.vlgmr.msra.gmra.mrb[16].mxu1 %v672_v58 }
 0x433   :  { %799 = vmatpush1.bf16.msra.mxu0 %v1459_v2  ;;  %840 = vmatpush1.bf16.msra.mxu1 %v1487_v7 }
 0x434   :  { %800 = vmatprep.subr.bf16.mxu0 %v1465_v3  ;;  %841 = vmatprep.subr.bf16.mxu1 %v1506_v10 }
 0x435   :  { %830 = vmatprep.mubr.bf16.mxu0 %v1432_v1  ;;  %871 = vmatprep.mubr.bf16.mxu1 %v1432_v1 }
 0x437   :  { %801 = vmatpush1.bf16.msra.mxu0 %v1471_v4  ;;  %842 = vmatpush1.bf16.msra.mxu1 %v1511_v11 }
 0x438   :  { %802 = vmatprep.subr.bf16.mxu0 %v1477_v5  ;;  %843 = vmatprep.subr.bf16.mxu1 %v1528_v14 }
 0x43b   :  { %803 = vmatpush1.bf16.msra.mxu0 %v1493_v8  ;;  %844 = vmatpush1.bf16.msra.mxu1 %v1535_v15 }
 0x43c   :  { %804 = vmatprep.subr.bf16.mxu0 %v1500_v9  ;;  %845 = vmatprep.subr.bf16.mxu1 %v1541_v16 }
 0x43f   :  { %805 = vmatpush1.bf16.msra.mxu0 %v1518_v12  ;;  %846 = vmatpush1.bf16.msra.mxu1 %v1559_v19 }
 0x440   :  { %806 = vmatprep.subr.bf16.mxu0 %v1523_v13  ;;  %847 = vmatprep.subr.bf16.mxu1 %v1565_v20 }
 0x443   :  { %807 = vmatpush1.bf16.msra.mxu0 %v1547_v17  ;;  %848 = vmatpush1.bf16.msra.mxu1 %v1583_v23 }
 0x444   :  { %808 = vmatprep.subr.bf16.mxu0 %v1553_v18  ;;  %849 = vmatprep.subr.bf16.mxu1 %v1589_v24 }
 0x447   :  { %809 = vmatpush1.bf16.msra.mxu0 %v1571_v21  ;;  %850 = vmatpush1.bf16.msra.mxu1 %v1607_v27 }
 0x448   :  { %810 = vmatprep.subr.bf16.mxu0 %v1576_v22  ;;  %851 = vmatprep.subr.bf16.mxu1 %v1613_v28 }
 0x44b   :  { %811 = vmatpush1.bf16.msra.mxu0 %v1595_v25  ;;  %852 = vmatpush1.bf16.msra.mxu1 %v1626_v30 }
 0x44c   :  { %812 = vmatprep.subr.bf16.mxu0 %v1601_v26  ;;  %853 = vmatprep.subr.bf16.mxu1 %v1632_v31 }
 0x44f   :  { %813 = vmatpush1.bf16.msra.mxu0 %v1619_v29  ;;  %854 = vmatpush1.bf16.msra.mxu1 %v1639_v32 }
 0x450   :  { %914 = vmatprep.subr.bf16.mxu0 %v1452_v0  ;;  %955 = vmatprep.subr.bf16.mxu1 %v1482_v6 }
 0x505   :  { %v716_v61 = vpop.f32.mrb[16].mxu0  ;;  %v757_v62 = vpop.f32.mrb[16].mxu1 }
 0x506   :  { %v717_v63 = vadd.f32 %v716_v61, %v678_v59  ;;  %v718_v34 = vpop.f32.mrb[17].mxu0  ;;  %v759_v36 = vpop.f32.mrb[17].mxu1  ;;  %v758_v35 = vadd.f32 %v757_v62, %v680_v45  ;;  %v1407_v45 = vld [vmem:[%s2041_s1 + $0x28] ss:$16 sps:$4 sm:$0xff]  }
 0x507   :  { %v719_v37 = vadd.f32 %v718_v34, %v679_v60  ;;  %v720_v38 = vpop.f32.mrb[18].mxu0  ;;  %v761_v0 = vpop.f32.mrb[18].mxu1  ;;  %v760_v44 = vadd.f32 %v759_v36, %v681_v43  ;;  %v1405_v43 = vld [vmem:[%s2041_s1 + $0x2c] ss:$16 sps:$4 sm:$0xff]  }
 0x508   :  { %v1200_v39 = vmul.f32 -1.442695, %v717_v63  ;;  %v721_v6 = vpop.f32.mrb[19].mxu0  ;;  %v762_v40 = vpop.f32.mrb[19].mxu1 }
 0x509   :  { %v1201_v41 = vmul.f32 -1.442695, %v719_v37  ;;  %v1202_v46 = vmul.f32 -1.442695, %v760_v44  ;;  %v1402_v6 = vld [vmem:[%s2041_s1] ss:$16 sps:$4 sm:$0xff]  }
 0x50a   :  { %1336 = vpow2.f32 %v1200_v39  ;;  %v1403_v40 = vld [vmem:[%s2041_s1 + $0x8] ss:$16 sps:$4 sm:$0xff]   ;;  %v1406_v44 = vld [vmem:[%s2041_s1 + $0x20] ss:$16 sps:$4 sm:$0xff]  }
 0x50b   :  { %1338 = vpow2.f32 %v1201_v41  ;;  %v1404_v41 = vld [vmem:[%s2041_s1 + $0x24] ss:$16 sps:$4 sm:$0xff]  }
 0x50c   :  { %1340 = vpow2.f32 %v1202_v46  ;;  %v1408_v46 = vld [vmem:[%s2041_s1 + $0x44] ss:$16 sps:$4 sm:$0xff]  }
 0x50d   :  { %1342 = vtanh.f32 %v758_v35  ;;  %v1409_v35 = vld [vmem:[%s2041_s1 + $0x4c] ss:$16 sps:$4 sm:$0xff]  }
 0x514   :  { %v1337_v47 = vpop.eup %1336 }
 0x515   :  { %v1339_v49 = vpop.eup %1338  ;;  %v767_v50 = vadd.f32 1.0, %v1337_v47  ;;  %v1411_v47 = vld [vmem:[%s2041_s1 + $0x48] ss:$16 sps:$4 sm:$0xff]  }
 0x516   :  { %v773_v51 = vadd.f32 1.0, %v1339_v49  ;;  %v1341_v52 = vpop.eup %1340  ;;  %v1412_v49 = vld [vmem:[%s2041_s1 + $0x64] ss:$16 sps:$4 sm:$0xff]  }
 0x517   :  { %1344 = vrcp.f32 %v767_v50  ;;  %v1343_v42 = vpop.eup %1342  ;;  %v780_v57 = vadd.f32 1.0, %v1341_v52  ;;  %v1413_v50 = vld [vmem:[%s2041_s1 + $0x6c] ss:$16 sps:$4 sm:$0xff]   ;;  %v1415_v52 = vld [vmem:[%s2041_s1 + $0x68] ss:$16 sps:$4 sm:$0xff]  }
 0x518   :  { %1346 = vrcp.f32 %v773_v51  ;;  %v1414_v51 = vld [vmem:[%s2041_s1 + $0x60] ss:$16 sps:$4 sm:$0xff]  }
 0x519   :  { %1348 = vrcp.f32 %v780_v57  ;;  %v1420_v57 = vld [vmem:[%s2041_s1 + $0xa4] ss:$16 sps:$4 sm:$0xff]  }
 0x521   :  { %v1345_v53 = vpop.eup %1344 }
 0x522   :  { %v1347_v55 = vpop.eup %1346  ;;  %v784_v56 = vmul.f32 %v1345_v53, %v1343_v42  ;;  %v1416_v42 = vld [vmem:[%s2041_s1 + $0x84] ss:$16 sps:$4 sm:$0xff]   ;;  %v1417_v53 = vld [vmem:[%s2041_s1 + $0x8c] ss:$16 sps:$4 sm:$0xff]  }
 0x523   :  { %v783_v58 = vmul.f32 %v1347_v55, %v1826_v54  ;;  %v1349_v59 = vpop.eup %1348  ;;  %v1418_v55 = vld [vmem:[%s2041_s1 + $0x80] ss:$16 sps:$4 sm:$0xff]  }
 0x525   :  { %v1873_v48 = vadd.f32 %v784_v56, %v783_v58  ;;  %v1419_v56 = vld [vmem:[%s2041_s1 + $0x88] ss:$16 sps:$4 sm:$0xff]   ;;  %v1421_v58 = vld [vmem:[%s2041_s1 + $0xac] ss:$16 sps:$4 sm:$0xff]  }
 0x527   :  { %1350 = vtanh.f32 %v1873_v48 }
 0x531   :  { %v1351_v60 = vpop.eup %1350 }
 0x532   :  { %v787_v61 = vmul.f32 %v1351_v60, %v1349_v59  ;;  %v1423_v59 = vld [vmem:[%s2041_s1 + $0xa8] ss:$16 sps:$4 sm:$0xff]   ;;  %v1424_v60 = vld [vmem:[%s2041_s1 + $0xc4] ss:$16 sps:$4 sm:$0xff]  }
 0x534   :  { %v788_v62 = vpack.c.bf16 %v787_v61, %v787_v61  ;;  %v1425_v61 = vld [vmem:[%s2041_s1 + $0xcc] ss:$16 sps:$4 sm:$0xff]  }
 0x536   :  { %1203 = vst [vmem:[%s2043_s2 + $0x10] sm:$0xf] %v788_v62  ;;  %831 = vmatmul.mubr.bf16.vlgmr.msra.gmra.mrb[20].mxu0 %v788_v62  ;;  %872 = vmatmul.mubr.bf16.vlgmr.msra.gmra.mrb[20].mxu1 %v788_v62  ;;  %v1426_v62 = vld [vmem:[%s2041_s1 + $0xc0] ss:$16 sps:$4 sm:$0xff]  }
 0x537   :  { %915 = vmatpush1.bf16.msra.mxu0 %v1459_v2  ;;  %956 = vmatpush1.bf16.msra.mxu1 %v1487_v7  ;;  %v1400_v2 = vld [vmem:[%s2041_s1 + $0x4] ss:$16 sps:$4 sm:$0xff]  }
 0x538   :  { %916 = vmatprep.subr.bf16.mxu0 %v1465_v3  ;;  %957 = vmatprep.subr.bf16.mxu1 %v1506_v10  ;;  %v1401_v3 = vld [vmem:[%s2041_s1 + $0xc] ss:$16 sps:$4 sm:$0xff]  }
 0x539   :  { %946 = vmatprep.mubr.bf16.mxu0 %v1432_v1  ;;  %987 = vmatprep.mubr.bf16.mxu1 %v1432_v1 }
 0x53b   :  { %917 = vmatpush1.bf16.msra.mxu0 %v1471_v4  ;;  %958 = vmatpush1.bf16.msra.mxu1 %v1511_v11  ;;  %v1204_v4 = vld [vmem:[%s2042_s0 + $0x50] sm:$0xff]  ;;  %v1205_v11 = vld [vmem:[%s2042_s0 + $0x58] sm:$0xff] }
 0x53c   :  { %918 = vmatprep.subr.bf16.mxu0 %v1477_v5  ;;  %959 = vmatprep.subr.bf16.mxu1 %v1528_v14  ;;  %v794_v5 = vunpack.c.l.bf16 %v1204_v4  ;;  %v795_v7 = vunpack.c.h.bf16 %v1204_v4  ;;  %v1429_v4 = vld [vmem:[%s2041_s1 + $0xec] ss:$16 sps:$4 sm:$0xff]  }
 0x53f   :  { %919 = vmatpush1.bf16.msra.mxu0 %v1493_v8  ;;  %960 = vmatpush1.bf16.msra.mxu1 %v1535_v15 }
 0x540   :  { %920 = vmatprep.subr.bf16.mxu0 %v1500_v9  ;;  %961 = vmatprep.subr.bf16.mxu1 %v1541_v16 }
 0x543   :  { %921 = vmatpush1.bf16.msra.mxu0 %v1518_v12  ;;  %962 = vmatpush1.bf16.msra.mxu1 %v1559_v19 }
 0x544   :  { %922 = vmatprep.subr.bf16.mxu0 %v1523_v13  ;;  %963 = vmatprep.subr.bf16.mxu1 %v1565_v20 }
 0x547   :  { %923 = vmatpush1.bf16.msra.mxu0 %v1547_v17  ;;  %964 = vmatpush1.bf16.msra.mxu1 %v1583_v23  ;;  %v796_v23 = vunpack.c.l.bf16 %v1205_v11 }
 0x548   :  { %924 = vmatprep.subr.bf16.mxu0 %v1553_v18  ;;  %965 = vmatprep.subr.bf16.mxu1 %v1589_v24 }
 0x54b   :  { %925 = vmatpush1.bf16.msra.mxu0 %v1571_v21  ;;  %966 = vmatpush1.bf16.msra.mxu1 %v1607_v27  ;;  %v797_v21 = vunpack.c.h.bf16 %v1205_v11 }
 0x54c   :  { %926 = vmatprep.subr.bf16.mxu0 %v1576_v22  ;;  %967 = vmatprep.subr.bf16.mxu1 %v1613_v28 }
 0x54f   :  { %927 = vmatpush1.bf16.msra.mxu0 %v1595_v25  ;;  %968 = vmatpush1.bf16.msra.mxu1 %v1626_v30 }
 0x550   :  { %928 = vmatprep.subr.bf16.mxu0 %v1601_v26  ;;  %969 = vmatprep.subr.bf16.mxu1 %v1632_v31 }
 0x553   :  { %929 = vmatpush1.bf16.msra.mxu0 %v1619_v29  ;;  %970 = vmatpush1.bf16.msra.mxu1 %v1639_v32 }
 0x554   :  { %1030 = vmatprep.subr.bf16.mxu0 %v1400_v2  ;;  %1071 = vmatprep.subr.bf16.mxu1 %v1401_v3  ;;  %v1427_v2 = vld [vmem:[%s2041_s1 + $0xc8] ss:$16 sps:$4 sm:$0xff]   ;;  %v1428_v3 = vld [vmem:[%s2041_s1 + $0xe4] ss:$16 sps:$4 sm:$0xff]  }
 0x609   :  { %v832_v8 = vpop.f32.mrb[20].mxu0  ;;  %v873_v9 = vpop.f32.mrb[20].mxu1 }
 0x60a   :  { %v833_v10 = vadd.f32 %v832_v8, %v794_v5  ;;  %v834_v12 = vpop.f32.mrb[21].mxu0  ;;  %v875_v13 = vpop.f32.mrb[21].mxu1  ;;  %v874_v25 = vadd.f32 %v873_v9, %v796_v23  ;;  %v1430_v5 = vld [vmem:[%s2041_s1 + $0xe0] ss:$16 sps:$4 sm:$0xff]  }
 0x60b   :  { %v835_v14 = vadd.f32 %v834_v12, %v795_v7  ;;  %v836_v15 = vpop.f32.mrb[22].mxu0  ;;  %v877_v16 = vpop.f32.mrb[22].mxu1  ;;  %v876_v22 = vadd.f32 %v875_v13, %v797_v21  ;;  %v1431_v7 = vld [vmem:[%s2041_s1 + $0xe8] ss:$16 sps:$4 sm:$0xff]   ;;  %v1210_v8 = vld [vmem:[%s2042_s0 + $0x60] sm:$0xff] }
 0x60c   :  { %v1206_v17 = vmul.f32 -1.442695, %v833_v10  ;;  %v837_v18 = vpop.f32.mrb[23].mxu0  ;;  %v878_v19 = vpop.f32.mrb[23].mxu1  ;;  %v910_v9 = vunpack.c.l.bf16 %v1210_v8  ;;  %v911_v10 = vunpack.c.h.bf16 %v1210_v8 }
 0x60d   :  { %v1207_v20 = vmul.f32 -1.442695, %v835_v14  ;;  %v1208_v24 = vmul.f32 -1.442695, %v876_v22  ;;  %v1211_v14 = vld [vmem:[%s2042_s0 + $0x68] sm:$0xff] }
 0x60e   :  { %1352 = vpow2.f32 %v1206_v17 }
 0x60f   :  { %1354 = vpow2.f32 %v1207_v20 }
 0x610   :  { %1356 = vpow2.f32 %v1208_v24  ;;  %v913_v24 = vunpack.c.h.bf16 %v1211_v14 }
 0x611   :  { %1358 = vtanh.f32 %v874_v25 }
 0x618   :  { %v1353_v26 = vpop.eup %1352 }
 0x619   :  { %v1355_v27 = vpop.eup %1354  ;;  %v883_v28 = vadd.f32 1.0, %v1353_v26  ;;  %v912_v26 = vunpack.c.l.bf16 %v1211_v14 }
 0x61a   :  { %v889_v29 = vadd.f32 1.0, %v1355_v27  ;;  %v1357_v30 = vpop.eup %1356 }
 0x61b   :  { %1360 = vrcp.f32 %v883_v28  ;;  %v1359_v31 = vpop.eup %1358  ;;  %v896_v33 = vadd.f32 1.0, %v1357_v30 }
 0x61c   :  { %1362 = vrcp.f32 %v889_v29 }
 0x61d   :  { %1364 = vrcp.f32 %v896_v33 }
 0x625   :  { %v1361_v32 = vpop.eup %1360 }
 0x626   :  { %v1363_v54 = vpop.eup %1362  ;;  %v900_v63 = vmul.f32 %v1361_v32, %v1359_v31 }
 0x627   :  { %v899_v34 = vmul.f32 %v1363_v54, %v1873_v48  ;;  %v1365_v37 = vpop.eup %1364  ;;  %v1422_v48 = vld [vmem:[%s2041_s1 + $0xa0] ss:$16 sps:$4 sm:$0xff]  }
 0x629   :  { %v1924_v36 = vadd.f32 %v900_v63, %v899_v34 }
 0x62b   :  { %1366 = vtanh.f32 %v1924_v36 }
 0x635   :  { %v1367_v38 = vpop.eup %1366 }
 0x636   :  { %v903_v0 = vmul.f32 %v1367_v38, %v1365_v37 }
 0x638   :  { %v904_v39 = vpack.c.bf16 %v903_v0, %v903_v0 }
 0x63a   :  { %1209 = vst [vmem:[%s2043_s2 + $0x14] sm:$0xf] %v904_v39  ;;  %947 = vmatmul.mubr.bf16.vlgmr.msra.gmra.mrb[24].mxu0 %v904_v39  ;;  %988 = vmatmul.mubr.bf16.vlgmr.msra.gmra.mrb[24].mxu1 %v904_v39 }
 0x63b   :  { %1031 = vmatpush1.bf16.msra.mxu0 %v1402_v6  ;;  %1072 = vmatpush1.bf16.msra.mxu1 %v1403_v40 }
 0x63c   :  { %1032 = vmatprep.subr.bf16.mxu0 %v1404_v41  ;;  %1073 = vmatprep.subr.bf16.mxu1 %v1405_v43 }
 0x63d   :  { %1062 = vmatprep.mubr.bf16.mxu0 %v1432_v1  ;;  %1103 = vmatprep.mubr.bf16.mxu1 %v1432_v1  ;;  %v1410_v1 = vld [vmem:[%s2041_s1 + $0x40] ss:$16 sps:$4 sm:$0xff]  }
 0x63f   :  { %1033 = vmatpush1.bf16.msra.mxu0 %v1406_v44  ;;  %1074 = vmatpush1.bf16.msra.mxu1 %v1407_v45  ;;  %v1216_v44 = vld [vmem:[%s2042_s0 + $0x70] sm:$0xff] }
 0x640   :  { %1034 = vmatprep.subr.bf16.mxu0 %v1408_v46  ;;  %1075 = vmatprep.subr.bf16.mxu1 %v1409_v35  ;;  %v1026_v45 = vunpack.c.l.bf16 %v1216_v44  ;;  %v1027_v46 = vunpack.c.h.bf16 %v1216_v44 }
 0x643   :  { %1035 = vmatpush1.bf16.msra.mxu0 %v1410_v1  ;;  %1076 = vmatpush1.bf16.msra.mxu1 %v1411_v47  ;;  %v1217_v47 = vld [vmem:[%s2042_s0 + $0x78] sm:$0xff] }
 0x644   :  { %1036 = vmatprep.subr.bf16.mxu0 %v1412_v49  ;;  %1077 = vmatprep.subr.bf16.mxu1 %v1413_v50 }
 0x647   :  { %1037 = vmatpush1.bf16.msra.mxu0 %v1414_v51  ;;  %1078 = vmatpush1.bf16.msra.mxu1 %v1415_v52 }
 0x648   :  { %1038 = vmatprep.subr.bf16.mxu0 %v1416_v42  ;;  %1079 = vmatprep.subr.bf16.mxu1 %v1417_v53 }
 0x64b   :  { %1039 = vmatpush1.bf16.msra.mxu0 %v1418_v55  ;;  %1080 = vmatpush1.bf16.msra.mxu1 %v1419_v56 }
 0x64c   :  { %1040 = vmatprep.subr.bf16.mxu0 %v1420_v57  ;;  %1081 = vmatprep.subr.bf16.mxu1 %v1421_v58  ;;  %v1029_v58 = vunpack.c.h.bf16 %v1217_v47 }
 0x64f   :  { %1041 = vmatpush1.bf16.msra.mxu0 %v1422_v48  ;;  %1082 = vmatpush1.bf16.msra.mxu1 %v1423_v59  ;;  %v1028_v59 = vunpack.c.l.bf16 %v1217_v47 }
 0x650   :  { %1042 = vmatprep.subr.bf16.mxu0 %v1424_v60  ;;  %1083 = vmatprep.subr.bf16.mxu1 %v1425_v61 }
 0x653   :  { %1043 = vmatpush1.bf16.msra.mxu0 %v1426_v62  ;;  %1084 = vmatpush1.bf16.msra.mxu1 %v1427_v2 }
 0x654   :  { %1044 = vmatprep.subr.bf16.mxu0 %v1428_v3  ;;  %1085 = vmatprep.subr.bf16.mxu1 %v1429_v4 }
 0x657   :  { %1045 = vmatpush1.bf16.msra.mxu0 %v1430_v5  ;;  %1086 = vmatpush1.bf16.msra.mxu1 %v1431_v7 }
 0x70d   :  { %v948_v11 = vpop.f32.mrb[24].mxu0  ;;  %v989_v12 = vpop.f32.mrb[24].mxu1 }
 0x70e   :  { %v949_v13 = vadd.f32 %v948_v11, %v910_v9  ;;  %v950_v15 = vpop.f32.mrb[25].mxu0  ;;  %v991_v16 = vpop.f32.mrb[25].mxu1  ;;  %v990_v28 = vadd.f32 %v989_v12, %v912_v26 }
 0x70f   :  { %v951_v17 = vadd.f32 %v950_v15, %v911_v10  ;;  %v952_v18 = vpop.f32.mrb[26].mxu0  ;;  %v993_v19 = vpop.f32.mrb[26].mxu1  ;;  %v992_v25 = vadd.f32 %v991_v16, %v913_v24 }
 0x710   :  { %v1212_v20 = vmul.f32 -1.442695, %v949_v13  ;;  %v953_v21 = vpop.f32.mrb[27].mxu0  ;;  %v994_v22 = vpop.f32.mrb[27].mxu1 }
 0x711   :  { %v1213_v23 = vmul.f32 -1.442695, %v951_v17  ;;  %v1214_v27 = vmul.f32 -1.442695, %v992_v25 }
 0x712   :  { %1368 = vpow2.f32 %v1212_v20 }
 0x713   :  { %1370 = vpow2.f32 %v1213_v23 }
 0x714   :  { %1372 = vpow2.f32 %v1214_v27 }
 0x715   :  { %1374 = vtanh.f32 %v990_v28 }
 0x71c   :  { %v1369_v29 = vpop.eup %1368 }
 0x71d   :  { %v1371_v30 = vpop.eup %1370  ;;  %v999_v31 = vadd.f32 1.0, %v1369_v29 }
 0x71e   :  { %v1005_v32 = vadd.f32 1.0, %v1371_v30  ;;  %v1373_v54 = vpop.eup %1372 }
 0x71f   :  { %1376 = vrcp.f32 %v999_v31  ;;  %v1375_v63 = vpop.eup %1374  ;;  %v1012_v38 = vadd.f32 1.0, %v1373_v54 }
 0x720   :  { %1378 = vrcp.f32 %v1005_v32 }
 0x721   :  { %1380 = vrcp.f32 %v1012_v38 }
 0x729   :  { %v1377_v33 = vpop.eup %1376 }
 0x72a   :  { %v1379_v34 = vpop.eup %1378  ;;  %v1016_v37 = vmul.f32 %v1377_v33, %v1375_v63 }
 0x72b   :  { %v1015_v0 = vmul.f32 %v1379_v34, %v1924_v36  ;;  %v1381_v6 = vpop.eup %1380 }
 0x72d   :  { %v1017_v39 = vadd.f32 %v1016_v37, %v1015_v0 }
 0x72f   :  { %1382 = vtanh.f32 %v1017_v39 }
 0x739   :  { %v1383_v40 = vpop.eup %1382 }
 0x73a   :  { %v1019_v41 = vmul.f32 %v1383_v40, %v1381_v6 }
 0x73c   :  { %v1020_v43 = vpack.c.bf16 %v1019_v41, %v1019_v41 }
 0x73e   :  { %1215 = vst [vmem:[%s2043_s2 + $0x18] sm:$0xf] %v1020_v43  ;;  %1063 = vmatmul.mubr.bf16.vlgmr.msra.gmra.mrb[28].mxu0 %v1020_v43  ;;  %1104 = vmatmul.mubr.bf16.vlgmr.msra.gmra.mrb[28].mxu1 %v1020_v43 }
 0x811   :  { %v1064_v36 = vpop.f32.mrb[28].mxu0  ;;  %v1105_v35 = vpop.f32.mrb[28].mxu1 }
 0x812   :  { %v1065_v1 = vadd.f32 %v1064_v36, %v1026_v45  ;;  %v1066_v49 = vpop.f32.mrb[29].mxu0  ;;  %v1107_v50 = vpop.f32.mrb[29].mxu1  ;;  %v1106_v61 = vadd.f32 %v1105_v35, %v1028_v59 }
 0x813   :  { %v1067_v51 = vadd.f32 %v1066_v49, %v1027_v46  ;;  %v1068_v52 = vpop.f32.mrb[30].mxu0  ;;  %v1109_v42 = vpop.f32.mrb[30].mxu1  ;;  %v1108_v48 = vadd.f32 %v1107_v50, %v1029_v58 }
 0x814   :  { %v1218_v53 = vmul.f32 -1.442695, %v1065_v1  ;;  %v1069_v55 = vpop.f32.mrb[31].mxu0  ;;  %v1110_v56 = vpop.f32.mrb[31].mxu1 }
 0x815   :  { %v1219_v57 = vmul.f32 -1.442695, %v1067_v51  ;;  %v1220_v60 = vmul.f32 -1.442695, %v1108_v48 }
 0x816   :  { %1384 = vpow2.f32 %v1218_v53 }
 0x817   :  { %1386 = vpow2.f32 %v1219_v57 }
 0x818   :  { %1388 = vpow2.f32 %v1220_v60 }
 0x819   :  { %1390 = vtanh.f32 %v1106_v61 }
 0x820   :  { %v1385_v62 = vpop.eup %1384 }
 0x821   :  { %v1387_v2 = vpop.eup %1386  ;;  %v1115_v3 = vadd.f32 1.0, %v1385_v62 }
 0x822   :  { %v1121_v4 = vadd.f32 1.0, %v1387_v2  ;;  %v1389_v5 = vpop.eup %1388 }
 0x823   :  { %1392 = vrcp.f32 %v1115_v3  ;;  %v1391_v7 = vpop.eup %1390  ;;  %v1128_v11 = vadd.f32 1.0, %v1389_v5 }
 0x824   :  { %1394 = vrcp.f32 %v1121_v4 }
 0x825   :  { %1396 = vrcp.f32 %v1128_v11 }
 0x82d   :  { %v1393_v8 = vpop.eup %1392 }
 0x82e   :  { %v1395_v9 = vpop.eup %1394  ;;  %v1132_v10 = vmul.f32 %v1393_v8, %v1391_v7 }
 0x82f   :  { %v1131_v12 = vmul.f32 %v1395_v9, %v1017_v39  ;;  %v1397_v14 = vpop.eup %1396 }
 0x831   :  { %v1133_v13 = vadd.f32 %v1132_v10, %v1131_v12 }
 0x833   :  { %1398 = vtanh.f32 %v1133_v13 }
 0x83d   :  { %v1399_v15 = vpop.eup %1398 }
 0x83e   :  { %v1135_v16 = vmul.f32 %v1399_v15, %v1397_v14 }
 0x840   :  { %v1136_v17 = vpack.c.bf16 %v1135_v16, %v1135_v16 }
 0x842   :  { %1221 = vst [vmem:[%s2043_s2 + $0x1c] sm:$0xf] %v1136_v17 }

</bundles_post_ra>
